<compile_context>
chip_gen: v6e
topology: v6e:2x2x1
jax: 0.10.0
libtpu: 0.0.40
codegen_flags: <defaults>
</compile_context>

<pallas_src>
import functools

import jax
import jax.numpy as jnp
import numpy as np
from jax.experimental import pallas as pl
from jax.experimental.pallas import tpu as pltpu


def _round_up(x, m):
    return ((x + m - 1) // m) * m


def _tensorcores_per_device():
    """Best-effort TensorCore count of the local device (2 on v7x megacore,
    1 on v5e/v6e). Falls back to 1 if the attribute is unavailable."""
    try:
        return max(int(getattr(jax.devices()[0], "num_cores", 1)), 1)
    except Exception:
        return 1


# ---------------------------------------------------------------------------
# Kernel: fc1 -> ReLU -> fc2 -> ReLU -> fc3 -> softmax on one batch tile.
# Weights/biases are VMEM-resident (constant block index); only x / out stream
# per grid step.  MXU inputs are the weights' dtype; accumulation and all
# elementwise math (bias add, ReLU, softmax) stay in f32 on every generation.
# ---------------------------------------------------------------------------
def _actor_kernel(x_ref, w1_ref, b1_ref, w2_ref, b2_ref, w3_ref, b3_ref, o_ref):
    x = x_ref[...].astype(w1_ref.dtype)            # in-kernel cast, no wrapper pass
    # fc1 + ReLU
    h1 = jnp.dot(x, w1_ref[...], preferred_element_type=jnp.float32)
    h1 = jnp.maximum(h1 + b1_ref[...], 0.0)
    # fc2 + ReLU
    h2 = jnp.dot(h1.astype(w2_ref.dtype), w2_ref[...],
                 preferred_element_type=jnp.float32)
    h2 = jnp.maximum(h2 + b2_ref[...], 0.0)
    # fc3 (output lanes padded to 128; padded columns carry f32 bias = -1e30)
    logits = jnp.dot(h2.astype(w3_ref.dtype), w3_ref[...],
                     preferred_element_type=jnp.float32) + b3_ref[...]
    # numerically stable softmax over the padded last dim; exp(-1e30 - m) == 0
    m = jnp.max(logits, axis=-1, keepdims=True)
    e = jnp.exp(logits - m)
    denom = jnp.sum(e, axis=-1, keepdims=True)
    inv = pl.reciprocal(denom, approx=True)        # EUP vrcp (otherwise-idle slot)
    inv = inv * (2.0 - denom * inv)                # one Newton step -> ~f32 accuracy
    o_ref[...] = (e * inv).astype(o_ref.dtype)


def prepare_params(params, compute_dtype=jnp.float32):
    """One-time parameter preparation: pad fc3 to 128 lane-dense output columns
    and cast weights to the MXU compute dtype.  Call ONCE and reuse the result
    so the per-step path is a single pallas_call.

    compute_dtype=jnp.bfloat16 is valid on v5e as well as v6e/v7x: only the MXU
    inputs are bf16; bias/ReLU/softmax math stays in f32.  Returns
    (prepared_params, out_size)."""
    w1, b1, w2, b2, w3, b3 = params
    out_size = int(w3.shape[1])
    out_pad = _round_up(max(out_size, 128), 128)
    cd = compute_dtype
    w3p = jnp.zeros((w3.shape[0], out_pad), w3.dtype).at[:, :out_size].set(w3)
    # Padded-column bias must stay f32: -1e30 would overflow to -inf in bf16.
    b3p = jnp.full((1, out_pad), -1e30, jnp.float32).at[:, :out_size].set(
        jnp.reshape(b3, (1, -1)).astype(jnp.float32))
    prepped = (
        w1.astype(cd), jnp.reshape(b1, (1, -1)).astype(jnp.float32),
        w2.astype(cd), jnp.reshape(b2, (1, -1)).astype(jnp.float32),
        w3p.astype(cd), b3p,
    )
    return prepped, out_size


@functools.partial(jax.jit, static_argnames=(
    "out_size", "block_b", "num_cores", "out_dtype", "trim_output"))
def ac_actor_forward(x, prepped, *, out_size, block_b=512, num_cores=1,
                     out_dtype=jnp.float32, trim_output=True):
    """Forward pass of AC_actor.  `prepped` comes from prepare_params().
    num_cores: TensorCores to split small batches across (2 on v7x).
    out_dtype: softmax output dtype (bf16 halves the dominant writeback stream
    if the consumer tolerates it)."""
    w1, b1, w2, b2, w3, b3 = prepped
    B, in_size = x.shape
    h1_size, h2_size, out_pad = w1.shape[1], w2.shape[1], w3.shape[1]
    cd = w1.dtype

    # sublane pack of the compute dtype: f32 = 8 rows/vreg, bf16 = 16
    row_align = 16 if jnp.dtype(cd).itemsize < 4 else 8
    n_cores = max(int(num_cores), 1)
    if B <= 2048:
        # small/medium batch: one tile per TensorCore (grid=(1,) on v5e/v6e,
        # balanced 2-way split on v7x) -> minimal per-step pipeline overhead.
        tb = _round_up(-(-B // n_cores), row_align)
    else:
        # large batch: 256-row multiples fill the 256x256 MXU height per pass.
        tb = _round_up(max(block_b, 256), 256)
    b_padded = _round_up(B, tb)
    xp = x if b_padded == B else jnp.pad(x, ((0, b_padded - B), (0, 0)))
    grid = (b_padded // tb,)

    w_itemsize = jnp.dtype(cd).itemsize
    flops = 2 * b_padded * (in_size * h1_size + h1_size * h2_size
                            + h2_size * out_pad)
    bytes_accessed = (
        b_padded * in_size * x.dtype.itemsize                       # x (f32, single DMA)
        + (in_size * h1_size + h1_size * h2_size
           + h2_size * out_pad) * w_itemsize                        # weights
        + (h1_size + h2_size + out_pad) * 4                         # biases (f32)
        + b_padded * out_pad * jnp.dtype(out_dtype).itemsize)       # output

    out = pl.pallas_call(
        _actor_kernel,
        out_shape=jax.ShapeDtypeStruct((b_padded, out_pad), out_dtype),
        grid_spec=pl.GridSpec(
            grid=grid,
            in_specs=[
                pl.BlockSpec((tb, in_size), lambda i: (i, 0)),   # x: tiled over batch
                pl.BlockSpec(w1.shape, lambda i: (0, 0)),        # weights/biases stay
                pl.BlockSpec(b1.shape, lambda i: (0, 0)),        # VMEM-resident
                pl.BlockSpec(w2.shape, lambda i: (0, 0)),
                pl.BlockSpec(b2.shape, lambda i: (0, 0)),
                pl.BlockSpec(w3.shape, lambda i: (0, 0)),
                pl.BlockSpec(b3.shape, lambda i: (0, 0)),
            ],
            out_specs=pl.BlockSpec((tb, out_pad), lambda i: (i, 0)),
        ),
        compiler_params=pltpu.CompilerParams(
            dimension_semantics=("parallel",)),                  # shards across 2 TCs on v7x
        cost_estimate=pl.CostEstimate(
            flops=flops,
            transcendentals=b_padded * (out_pad + 1),
            bytes_accessed=bytes_accessed),
    )(xp, w1, b1, w2, b2, w3, b3)

    if trim_output:
        return out[:B, :out_size]
    # consumer can sample directly from the lane-dense padded probs (pad cols are 0)
    return out


def init_params(key, input_size, output_size):
    """Init matching the PyTorch module:
      fc1/fc2 weights: kaiming_uniform_(nonlinearity='relu') -> bound = sqrt(2)*sqrt(3/fan_in)
      fc3 weight + all biases: PyTorch nn.Linear default -> uniform(+/- 1/sqrt(fan_in))
    Weights are stored transposed as (fan_in, fan_out)."""
    k1, k2, k3, kb1, kb2, kb3 = jax.random.split(key, 6)

    def kaiming_uniform(k, fan_in, fan_out):
        bound = np.sqrt(2.0) * np.sqrt(3.0 / fan_in)
        return jax.random.uniform(k, (fan_in, fan_out), jnp.float32, -bound, bound)

    def default_linear_w(k, fan_in, fan_out):
        bound = 1.0 / np.sqrt(fan_in)
        return jax.random.uniform(k, (fan_in, fan_out), jnp.float32, -bound, bound)

    def default_bias(k, fan_in, fan_out):
        bound = 1.0 / np.sqrt(fan_in)
        return jax.random.uniform(k, (1, fan_out), jnp.float32, -bound, bound)

    w1 = kaiming_uniform(k1, input_size, 256)
    b1 = default_bias(kb1, input_size, 256)
    w2 = kaiming_uniform(k2, 256, 64)
    b2 = default_bias(kb2, 256, 64)
    w3 = default_linear_w(k3, 64, output_size)
    b3 = default_bias(kb3, 64, output_size)
    return (w1, b1, w2, b2, w3, b3)


def reference_forward(x, params):
    w1, b1, w2, b2, w3, b3 = params
    h1 = jnp.maximum(x @ w1 + b1, 0.0)
    h2 = jnp.maximum(h1 @ w2 + b2, 0.0)
    logits = h2 @ w3 + b3
    return jax.nn.softmax(logits, axis=-1)


if __name__ == "__main__":
    key = jax.random.PRNGKey(0)
    input_size, output_size, batch = 32, 8, 200   # non-multiples -> exercises padding

    kx, kp = jax.random.split(key)
    x = jax.random.normal(kx, (batch, input_size), dtype=jnp.float32)
    params = init_params(kp, input_size, output_size)
    ref = reference_forward(x, params)

    num_cores = _tensorcores_per_device()         # 2 on v7x, 1 on v5e/v6e

    # ---- f32 path: tight tolerance ----------------------------------------
    prepped_f32, out_size = prepare_params(params, compute_dtype=jnp.float32)
    prepped_f32 = jax.block_until_ready(prepped_f32)   # one-time prep, then reused
    out_f32 = jax.block_until_ready(
        ac_actor_forward(x, prepped_f32, out_size=out_size, num_cores=num_cores))
    np.testing.assert_allclose(np.asarray(out_f32), np.asarray(ref),
                               rtol=1e-5, atol=1e-5)
    np.testing.assert_allclose(np.asarray(out_f32).sum(axis=-1),
                               np.ones(batch), rtol=1e-5, atol=1e-5)

    # ---- bf16 MXU inputs + bf16 writeback (valid on v5e/v6e/v7x) -----------
    prepped_bf16, _ = prepare_params(params, compute_dtype=jnp.bfloat16)
    prepped_bf16 = jax.block_until_ready(prepped_bf16)
    out_bf16 = jax.block_until_ready(
        ac_actor_forward(x, prepped_bf16, out_size=out_size, num_cores=num_cores,
                         out_dtype=jnp.bfloat16))
    out_bf16_f32 = np.asarray(out_bf16.astype(jnp.float32))
    np.testing.assert_allclose(out_bf16_f32, np.asarray(ref), atol=3e-2)
    np.testing.assert_allclose(out_bf16_f32.sum(axis=-1),
                               np.ones(batch), rtol=2e-2, atol=2e-2)

    # ---- explicit 2-tile split (v7x dual-TensorCore path; correct anywhere) -
    out_2tile = jax.block_until_ready(
        ac_actor_forward(x, prepped_f32, out_size=out_size, num_cores=2))
    np.testing.assert_allclose(np.asarray(out_2tile), np.asarray(out_f32),
                               rtol=1e-6, atol=1e-6)

    print("KERNEL_OK")
</pallas_src>

<mosaic_0001>
module attributes {stable_mosaic.version = 11 : i64} {
  func.func @_actor_kernel(%arg0: i32, %arg1: memref<200x32xf32, #tpu.memory_space<vmem>>, %arg2: memref<32x256xf32, #tpu.memory_space<vmem>>, %arg3: memref<1x256xf32, #tpu.memory_space<vmem>>, %arg4: memref<256x64xf32, #tpu.memory_space<vmem>>, %arg5: memref<1x64xf32, #tpu.memory_space<vmem>>, %arg6: memref<64x128xf32, #tpu.memory_space<vmem>>, %arg7: memref<1x128xf32, #tpu.memory_space<vmem>>, %arg8: memref<200x128xf32, #tpu.memory_space<vmem>>) attributes {dimension_semantics = [#tpu.dimension_semantics<parallel>], iteration_bounds = array<i64: 1>, scalar_prefetch = 0 : i64, scratch_operands = 0 : i64, tpu.core_type = #tpu.core_type<tc>, window_params = [{transform_indices = @transform_0, window_bounds = array<i64: 200, 32>}, {pipeline_mode = #tpu.pipeline_mode<synchronous>, transform_indices = @transform_1, window_bounds = array<i64: 32, 256>}, {pipeline_mode = #tpu.pipeline_mode<synchronous>, transform_indices = @transform_2, window_bounds = array<i64: 1, 256>}, {pipeline_mode = #tpu.pipeline_mode<synchronous>, transform_indices = @transform_3, window_bounds = array<i64: 256, 64>}, {pipeline_mode = #tpu.pipeline_mode<synchronous>, transform_indices = @transform_4, window_bounds = array<i64: 1, 64>}, {pipeline_mode = #tpu.pipeline_mode<synchronous>, transform_indices = @transform_5, window_bounds = array<i64: 64, 128>}, {pipeline_mode = #tpu.pipeline_mode<synchronous>, transform_indices = @transform_6, window_bounds = array<i64: 1, 128>}, {transform_indices = @transform_7, window_bounds = array<i64: 200, 128>}]} {
    %c0 = arith.constant 0 : index
    %c0_0 = arith.constant 0 : index
    %0 = vector.load %arg1[%c0, %c0_0] : memref<200x32xf32, #tpu.memory_space<vmem>>, vector<200x32xf32>
    %c0_1 = arith.constant 0 : index
    %c0_2 = arith.constant 0 : index
    %1 = vector.load %arg2[%c0_1, %c0_2] : memref<32x256xf32, #tpu.memory_space<vmem>>, vector<32x256xf32>
    %cst = arith.constant dense<0.000000e+00> : vector<200x256xf32>
    %2 = tpu.matmul %0, %1, %cst {dimension_numbers = #tpu.dot_dimension_numbers<[1], [0], [0], [1], [0, 0, 1, 1], [], []>} : vector<200x32xf32>, vector<32x256xf32>, vector<200x256xf32> -> vector<200x256xf32>
    %c0_3 = arith.constant 0 : index
    %c0_4 = arith.constant 0 : index
    %3 = vector.load %arg3[%c0_3, %c0_4] : memref<1x256xf32, #tpu.memory_space<vmem>>, vector<1x256xf32>
    %4 = vector.broadcast %3 : vector<1x256xf32> to vector<200x256xf32>
    %5 = arith.addf %2, %4 : vector<200x256xf32>
    %cst_5 = arith.constant 0.000000e+00 : f32
    %6 = vector.broadcast %cst_5 : f32 to vector<200x256xf32>
    %7 = arith.maximumf %5, %6 : vector<200x256xf32>
    %c0_6 = arith.constant 0 : index
    %c0_7 = arith.constant 0 : index
    %8 = vector.load %arg4[%c0_6, %c0_7] : memref<256x64xf32, #tpu.memory_space<vmem>>, vector<256x64xf32>
    %cst_8 = arith.constant dense<0.000000e+00> : vector<200x64xf32>
    %9 = tpu.matmul %7, %8, %cst_8 {dimension_numbers = #tpu.dot_dimension_numbers<[1], [0], [0], [1], [0, 0, 1, 1], [], []>} : vector<200x256xf32>, vector<256x64xf32>, vector<200x64xf32> -> vector<200x64xf32>
    %c0_9 = arith.constant 0 : index
    %c0_10 = arith.constant 0 : index
    %10 = vector.load %arg5[%c0_9, %c0_10] : memref<1x64xf32, #tpu.memory_space<vmem>>, vector<1x64xf32>
    %11 = vector.broadcast %10 : vector<1x64xf32> to vector<200x64xf32>
    %12 = arith.addf %9, %11 : vector<200x64xf32>
    %cst_11 = arith.constant 0.000000e+00 : f32
    %13 = vector.broadcast %cst_11 : f32 to vector<200x64xf32>
    %14 = arith.maximumf %12, %13 : vector<200x64xf32>
    %c0_12 = arith.constant 0 : index
    %c0_13 = arith.constant 0 : index
    %15 = vector.load %arg6[%c0_12, %c0_13] : memref<64x128xf32, #tpu.memory_space<vmem>>, vector<64x128xf32>
    %cst_14 = arith.constant dense<0.000000e+00> : vector<200x128xf32>
    %16 = tpu.matmul %14, %15, %cst_14 {dimension_numbers = #tpu.dot_dimension_numbers<[1], [0], [0], [1], [0, 0, 1, 1], [], []>} : vector<200x64xf32>, vector<64x128xf32>, vector<200x128xf32> -> vector<200x128xf32>
    %c0_15 = arith.constant 0 : index
    %c0_16 = arith.constant 0 : index
    %17 = vector.load %arg7[%c0_15, %c0_16] : memref<1x128xf32, #tpu.memory_space<vmem>>, vector<1x128xf32>
    %18 = vector.broadcast %17 : vector<1x128xf32> to vector<200x128xf32>
    %19 = arith.addf %16, %18 : vector<200x128xf32>
    %cst_17 = arith.constant dense<0xFF800000> : vector<200xf32>
    %20 = vector.multi_reduction <maximumf>, %19, %cst_17 [1] : vector<200x128xf32> to vector<200xf32>
    %21 = vector.shape_cast %20 : vector<200xf32> to vector<200x1xf32>
    %22 = vector.broadcast %21 : vector<200x1xf32> to vector<200x128xf32>
    %23 = arith.subf %19, %22 : vector<200x128xf32>
    %24 = math.exp %23 : vector<200x128xf32>
    %cst_18 = arith.constant dense<0.000000e+00> : vector<200xf32>
    %25 = vector.multi_reduction <add>, %24, %cst_18 [1] : vector<200x128xf32> to vector<200xf32>
    %26 = vector.shape_cast %25 : vector<200xf32> to vector<200x1xf32>
    %27 = tpu.reciprocal %26 {approx = true} : vector<200x1xf32> -> vector<200x1xf32>
    %28 = arith.mulf %26, %27 : vector<200x1xf32>
    %cst_19 = arith.constant 2.000000e+00 : f32
    %29 = vector.broadcast %cst_19 : f32 to vector<200x1xf32>
    %30 = arith.subf %29, %28 : vector<200x1xf32>
    %31 = arith.mulf %27, %30 : vector<200x1xf32>
    %32 = vector.broadcast %31 : vector<200x1xf32> to vector<200x128xf32>
    %33 = arith.mulf %24, %32 : vector<200x128xf32>
    %c0_20 = arith.constant 0 : index
    %c0_21 = arith.constant 0 : index
    %34 = vector.load %arg8[%c0_20, %c0_21] : memref<200x128xf32, #tpu.memory_space<vmem>>, vector<200x128xf32>
    tpu.vector_store %arg8[%c0_20, %c0_21], %33 {strides = array<i32>} : memref<200x128xf32, #tpu.memory_space<vmem>>, vector<200x128xf32>,
    return
  }
  func.func @transform_0(%arg0: i32) -> (i32, i32) {
    %c0_i32 = arith.constant 0 : i32
    %c0_i32_0 = arith.constant 0 : i32
    return %arg0, %c0_i32 : i32, i32
  }
  func.func @transform_1(%arg0: i32) -> (i32, i32) {
    %c0_i32 = arith.constant 0 : i32
    %c0_i32_0 = arith.constant 0 : i32
    %c0_i32_1 = arith.constant 0 : i32
    return %c0_i32, %c0_i32_0 : i32, i32
  }
  func.func @transform_2(%arg0: i32) -> (i32, i32) {
    %c0_i32 = arith.constant 0 : i32
    %c0_i32_0 = arith.constant 0 : i32
    %c0_i32_1 = arith.constant 0 : i32
    return %c0_i32, %c0_i32_0 : i32, i32
  }
  func.func @transform_3(%arg0: i32) -> (i32, i32) {
    %c0_i32 = arith.constant 0 : i32
    %c0_i32_0 = arith.constant 0 : i32
    %c0_i32_1 = arith.constant 0 : i32
    return %c0_i32, %c0_i32_0 : i32, i32
  }
  func.func @transform_4(%arg0: i32) -> (i32, i32) {
    %c0_i32 = arith.constant 0 : i32
    %c0_i32_0 = arith.constant 0 : i32
    %c0_i32_1 = arith.constant 0 : i32
    return %c0_i32, %c0_i32_0 : i32, i32
  }
  func.func @transform_5(%arg0: i32) -> (i32, i32) {
    %c0_i32 = arith.constant 0 : i32
    %c0_i32_0 = arith.constant 0 : i32
    %c0_i32_1 = arith.constant 0 : i32
    return %c0_i32, %c0_i32_0 : i32, i32
  }
  func.func @transform_6(%arg0: i32) -> (i32, i32) {
    %c0_i32 = arith.constant 0 : i32
    %c0_i32_0 = arith.constant 0 : i32
    %c0_i32_1 = arith.constant 0 : i32
    return %c0_i32, %c0_i32_0 : i32, i32
  }
  func.func @transform_7(%arg0: i32) -> (i32, i32) {
    %c0_i32 = arith.constant 0 : i32
    %c0_i32_0 = arith.constant 0 : i32
    return %arg0, %c0_i32 : i32, i32
  }
}

</mosaic_0001>

<bundles_post_ra>
// kernel: ac_actor_forward.1
= control target key start
LH: loop header
LB: loop body
LE: loop exit
PB: predicated region body
PF: predicated region fallthrough
CT: control target
= control target key end

     0   :  { %v1570_v3 = vmov 0.0   ;;  %vm71_vm0 = vcmask 261120   ;;  %vm1571_vm1 = vmmov 0   ;;  %vm681_vm2 = vcmask 523264   ;;  %s2396_s1 = inlined_call_operand.vmem [shape: f32[32,256], index: 1, kind: input, shape index: {}]   ;;  %s2397_s0 = inlined_call_operand.vmem [shape: f32[200,32], index: 0, kind: input, shape index: {}]   ;;  %s2398_s3 = inlined_call_operand.vmem [shape: f32[256,64], index: 3, kind: input, shape index: {}]   ;;  %s2399_s5 = inlined_call_operand.vmem [shape: f32[64,128], index: 5, kind: input, shape index: {}]   ;;  %s2400_s2 = inlined_call_operand.vmem [shape: f32[1,256], index: 2, kind: input, shape index: {}]   ;;  %s2401_s4 = inlined_call_operand.vmem [shape: f32[1,64], index: 4, kind: input, shape index: {}]   ;;  %s2402_s6 = inlined_call_operand.vmem [shape: f32[1,128], index: 6, kind: input, shape index: {}]   ;;  %s2403_s7 = inlined_call_operand.vmem [shape: f32[200,128], index: 7, kind: output, shape index: {}]  }
   0x1   :  { %v58_v0 = vld [vmem:[%s2396_s1 + $0x38] sm:$0xff]  ;;  %v57_v1 = vld [vmem:[%s2396_s1 + $0x30] sm:$0xff]  ;;  %v56_v2 = vld [vmem:[%s2396_s1 + $0x28] sm:$0xff]  ;;  %211 = vmatprep.mubr.f32.mxu0 %v1570_v3  ;;  %451 = vmatprep.subr.mxu1 %v1570_v3 }
   0x2   :  { %171 = vmatprep.subr.mxu0 %v58_v0  ;;  %v55_v4 = vld [vmem:[%s2396_s1 + $0x20] sm:$0xff]  ;;  %v54_v5 = vld [vmem:[%s2396_s1 + $0x18] sm:$0xff]  ;;  %v53_v6 = vld [vmem:[%s2396_s1 + $0x10] sm:$0xff] }
   0x3   :  { %172 = vmatpush1.msra.mxu0 %v57_v1  ;;  %v52_v7 = vld [vmem:[%s2396_s1 + $0x8] sm:$0xff]  ;;  %v51_v8 = vld [vmem:[%s2396_s1] sm:$0xff]  ;;  %v427_v11 = vld [vmem:[%s2398_s3 + $0x78] sm:$0xff] }
   0x4   :  { %173 = vmatprep.subr.mxu0 %v56_v2  ;;  %v26_v9 = vld [vmem:[%s2397_s0] sm:$0xff]  ;;  %v27_v10 = vld [vmem:[%s2397_s0 + $0x8] sm:$0xff]  ;;  %v426_v12 = vld [vmem:[%s2398_s3 + $0x70] sm:$0xff]  ;;  %452 = vmatpush1.msra.mxu1 %v427_v11 }
   0x5   :  { %174 = vmatpush1.msra.mxu0 %v55_v4  ;;  %453 = vmatprep.subr.mxu1 %v1570_v3  ;;  %v425_v13 = vld [vmem:[%s2398_s3 + $0x68] sm:$0xff]  ;;  %v28_v14 = vld [vmem:[%s2397_s0 + $0x10] sm:$0xff]  ;;  %v424_v15 = vld [vmem:[%s2398_s3 + $0x60] sm:$0xff] }
   0x6   :  { %175 = vmatprep.subr.mxu0 %v54_v5  ;;  %454 = vmatpush1.msra.mxu1 %v426_v12  ;;  %v423_v16 = vld [vmem:[%s2398_s3 + $0x58] sm:$0xff]  ;;  %v422_v18 = vld [vmem:[%s2398_s3 + $0x50] sm:$0xff]  ;;  %v421_v19 = vld [vmem:[%s2398_s3 + $0x48] sm:$0xff] }
   0x7   :  { %176 = vmatpush1.msra.mxu0 %v53_v6  ;;  %455 = vmatprep.subr.mxu1 %v1570_v3  ;;  %v29_v17 = vld [vmem:[%s2397_s0 + $0x18] sm:$0xff]  ;;  %v30_v20 = vld [vmem:[%s2397_s0 + $0x20] sm:$0xff]  ;;  %v31_v23 = vld [vmem:[%s2397_s0 + $0x28] sm:$0xff] }
   0x8   :  { %177 = vmatprep.subr.mxu0 %v52_v7  ;;  %456 = vmatpush1.msra.mxu1 %v425_v13  ;;  %v420_v21 = vld [vmem:[%s2398_s3 + $0x40] sm:$0xff]  ;;  %v419_v22 = vld [vmem:[%s2398_s3 + $0x38] sm:$0xff]  ;;  %v418_v24 = vld [vmem:[%s2398_s3 + $0x30] sm:$0xff] }
   0x9   :  { %178 = vmatpush1.msra.mxu0 %v51_v8  ;;  %457 = vmatprep.subr.mxu1 %v1570_v3  ;;  %v417_v25 = vld [vmem:[%s2398_s3 + $0x28] sm:$0xff]  ;;  %v32_v26 = vld [vmem:[%s2397_s0 + $0x30] sm:$0xff]  ;;  %v416_v27 = vld [vmem:[%s2398_s3 + $0x20] sm:$0xff] }
   0xa   :  { %1276 = vmatmul.mubr.msk.f32.vlgmr.msra.gmra.mxu0 %vm71_vm0, %v26_v9  ;;  %1361 = vmatprep.subr.mxu0 %v1570_v3  ;;  %v415_v28 = vld [vmem:[%s2398_s3 + $0x18] sm:$0xff]  ;;  %v414_v30 = vld [vmem:[%s2398_s3 + $0x10] sm:$0xff]  ;;  %v413_v31 = vld [vmem:[%s2398_s3 + $0x8] sm:$0xff]  ;;  %v61_v9 = vlaneseq }
   0xb   :  { %217 = vmatprep.mubr.f32.mxu0 %v1570_v3  ;;  %458 = vmatpush1.msra.mxu1 %v424_v15  ;;  %v33_v29 = vld [vmem:[%s2397_s0 + $0x38] sm:$0xff]  ;;  %v34_v32 = vld [vmem:[%s2397_s0 + $0x40] sm:$0xff]  ;;  %v35_v35 = vld [vmem:[%s2397_s0 + $0x48] sm:$0xff] }
   0xc   :  { %459 = vmatprep.subr.mxu1 %v1570_v3  ;;  %v412_v33 = vld [vmem:[%s2398_s3] sm:$0xff]  ;;  %v443_v34 = vld [vmem:[%s2398_s3 + $0xf8] sm:$0xff]  ;;  %v442_v36 = vld [vmem:[%s2398_s3 + $0xf0] sm:$0xff]  ;;  %v62_v11 = vshrl.u32 %v61_v9, 7 }
   0xd   :  { %460 = vmatpush1.msra.mxu1 %v423_v16  ;;  %v441_v37 = vld [vmem:[%s2398_s3 + $0xe8] sm:$0xff]  ;;  %v36_v38 = vld [vmem:[%s2397_s0 + $0x50] sm:$0xff]  ;;  %v440_v39 = vld [vmem:[%s2398_s3 + $0xe0] sm:$0xff] }
   0xe   :  { %1277 = vmatmul.mubr.msk.f32.gmra.mxu0 %vm71_vm0, %v27_v10  ;;  %461 = vmatprep.subr.mxu1 %v1570_v3  ;;  %v439_v40 = vld [vmem:[%s2398_s3 + $0xd8] sm:$0xff]  ;;  %v438_v42 = vld [vmem:[%s2398_s3 + $0xd0] sm:$0xff]  ;;  %v437_v43 = vld [vmem:[%s2398_s3 + $0xc8] sm:$0xff]  ;;  %v63_v12 = vsub.s32 0, %v62_v11 }
   0xf   :  { %223 = vmatprep.mubr.f32.mxu0 %v1570_v3  ;;  %462 = vmatpush1.msra.mxu1 %v422_v18  ;;  %v37_v41 = vld [vmem:[%s2397_s0 + $0x58] sm:$0xff]  ;;  %v38_v44 = vld [vmem:[%s2397_s0 + $0x60] sm:$0xff]  ;;  %v39_v47 = vld [vmem:[%s2397_s0 + $0x68] sm:$0xff] }
  0x10   :  { %463 = vmatprep.subr.mxu1 %v1570_v3  ;;  %v436_v45 = vld [vmem:[%s2398_s3 + $0xc0] sm:$0xff]  ;;  %v435_v46 = vld [vmem:[%s2398_s3 + $0xb8] sm:$0xff]  ;;  %v434_v48 = vld [vmem:[%s2398_s3 + $0xb0] sm:$0xff] }
  0x11   :  { %464 = vmatpush1.msra.mxu1 %v421_v19  ;;  %v433_v49 = vld [vmem:[%s2398_s3 + $0xa8] sm:$0xff]  ;;  %v40_v50 = vld [vmem:[%s2397_s0 + $0x70] sm:$0xff]  ;;  %v432_v51 = vld [vmem:[%s2398_s3 + $0xa0] sm:$0xff] }
  0x12   :  { %1278 = vmatmul.mubr.msk.f32.gmra.mxu0 %vm71_vm0, %v28_v14  ;;  %465 = vmatprep.subr.mxu1 %v1570_v3  ;;  %v41_v52 = vld [vmem:[%s2397_s0 + $0x78] sm:$0xff]  ;;  %v42_v53 = vld [vmem:[%s2397_s0 + $0x80] sm:$0xff]  ;;  %v43_v55 = vld [vmem:[%s2397_s0 + $0x88] sm:$0xff]  ;;  %v67_v14 = vsub.s32 1, %v62_v11 }
  0x13   :  { %229 = vmatprep.mubr.f32.mxu0 %v1570_v3  ;;  %466 = vmatpush1.msra.mxu1 %v420_v21  ;;  %v431_v54 = vld [vmem:[%s2398_s3 + $0x98] sm:$0xff]  ;;  %v430_v56 = vld [vmem:[%s2398_s3 + $0x90] sm:$0xff]  ;;  %v429_v57 = vld [vmem:[%s2398_s3 + $0x88] sm:$0xff] }
  0x14   :  { %467 = vmatprep.subr.mxu1 %v1570_v3  ;;  %v44_v58 = vld [vmem:[%s2397_s0 + $0x90] sm:$0xff]  ;;  %v428_v59 = vld [vmem:[%s2398_s3 + $0x80] sm:$0xff]  ;;  %v45_v60 = vld [vmem:[%s2397_s0 + $0x98] sm:$0xff] }
  0x15   :  { %468 = vmatpush1.msra.mxu1 %v419_v22  ;;  %v46_v61 = vld [vmem:[%s2397_s0 + $0xa0] sm:$0xff]  ;;  %v47_v62 = vld [vmem:[%s2397_s0 + $0xa8] sm:$0xff]  ;;  %v48_v63 = vld [vmem:[%s2397_s0 + $0xb0] sm:$0xff] }
  0x16   :  { %1279 = vmatmul.mubr.msk.f32.gmra.mxu0 %vm71_vm0, %v29_v17  ;;  %469 = vmatprep.subr.mxu1 %v1570_v3  ;;  %v49_v0 = vld [vmem:[%s2397_s0 + $0xb8] sm:$0xff]  ;;  %v50_v1 = vld [vmem:[%s2397_s0 + $0xc0] sm:$0xff]  ;;  %v672_v4 = vld [vmem:[%s2399_s5 + $0x30] sm:$0xff] }
  0x17   :  { %235 = vmatprep.mubr.f32.mxu0 %v1570_v3  ;;  %470 = vmatpush1.msra.mxu1 %v418_v24  ;;  %v673_v2 = vld [vmem:[%s2399_s5 + $0x38] sm:$0xff]  ;;  %v671_v5 = vld [vmem:[%s2399_s5 + $0x28] sm:$0xff]  ;;  %v670_v6 = vld [vmem:[%s2399_s5 + $0x20] sm:$0xff] }
  0x18   :  { %471 = vmatprep.subr.mxu1 %v1570_v3  ;;  %1362 = vmatpush3.msra.mxu0 %v673_v2  ;;  %v669_v7 = vld [vmem:[%s2399_s5 + $0x18] sm:$0xff]  ;;  %v668_v8 = vld [vmem:[%s2399_s5 + $0x10] sm:$0xff]  ;;  %v667_v10 = vld [vmem:[%s2399_s5 + $0x8] sm:$0xff] }
  0x19   :  { %472 = vmatpush1.msra.mxu1 %v417_v25  ;;  %1363 = vmatprep.subr.mxu0 %v1570_v3  ;;  %v59_v13 = vld [vmem:[%s2400_s2] sm:$0x3] }
  0x1a   :  { %1280 = vmatmul.mubr.msk.f32.gmra.mxu0 %vm71_vm0, %v30_v20  ;;  %473 = vmatprep.subr.mxu1 %v1570_v3  ;;  %v1922_v15 = vrot.slane %v59_v13, %v63_v12  ;;  %v1924_v16 = vrot.slane %v59_v13, %v67_v14 }
  0x1b   :  { %241 = vmatprep.mubr.f32.mxu0 %v1570_v3  ;;  %474 = vmatpush1.msra.mxu1 %v416_v27 }
  0x1c   :  { %475 = vmatprep.subr.mxu1 %v1570_v3  ;;  %1364 = vmatpush3.msra.mxu0 %v672_v4 }
  0x1d   :  { %476 = vmatpush1.msra.mxu1 %v415_v28  ;;  %1365 = vmatprep.subr.mxu0 %v1570_v3 }
  0x1e   :  { %1281 = vmatmul.mubr.msk.f32.gmra.mxu0 %vm71_vm0, %v31_v23  ;;  %477 = vmatprep.subr.mxu1 %v1570_v3 }
  0x1f   :  { %247 = vmatprep.mubr.f32.mxu0 %v1570_v3  ;;  %478 = vmatpush1.msra.mxu1 %v414_v30 }
  0x20   :  { %479 = vmatprep.subr.mxu1 %v1570_v3  ;;  %1366 = vmatpush3.msra.mxu0 %v671_v5 }
  0x21   :  { %480 = vmatpush1.msra.mxu1 %v413_v31  ;;  %1367 = vmatprep.subr.mxu0 %v1570_v3 }
  0x22   :  { %1282 = vmatmul.mubr.msk.f32.gmra.mxu0 %vm71_vm0, %v32_v26  ;;  %481 = vmatprep.subr.mxu1 %v1570_v3 }
  0x23   :  { %253 = vmatprep.mubr.f32.mxu0 %v1570_v3  ;;  %482 = vmatpush1.msra.mxu1 %v412_v33 }
  0x24   :  { %483 = vmatprep.subr.mxu1 %v1570_v3  ;;  %1368 = vmatpush3.msra.mxu0 %v670_v6 }
  0x25   :  { %484 = vmatpush2.msra.mxu1 %v443_v34  ;;  %1369 = vmatprep.subr.mxu0 %v1570_v3 }
  0x26   :  { %1283 = vmatmul.mubr.msk.f32.gmra.mxu0 %vm71_vm0, %v33_v29  ;;  %485 = vmatprep.subr.mxu1 %v1570_v3 }
  0x27   :  { %259 = vmatprep.mubr.f32.mxu0 %v1570_v3  ;;  %486 = vmatpush2.msra.mxu1 %v442_v36 }
  0x28   :  { %487 = vmatprep.subr.mxu1 %v1570_v3  ;;  %1370 = vmatpush3.msra.mxu0 %v669_v7 }
  0x29   :  { %488 = vmatpush2.msra.mxu1 %v441_v37  ;;  %1371 = vmatprep.subr.mxu0 %v1570_v3 }
  0x2a   :  { %1284 = vmatmul.mubr.msk.f32.gmra.mxu0 %vm71_vm0, %v34_v32  ;;  %489 = vmatprep.subr.mxu1 %v1570_v3 }
  0x2b   :  { %265 = vmatprep.mubr.f32.mxu0 %v1570_v3  ;;  %490 = vmatpush2.msra.mxu1 %v440_v39 }
  0x2c   :  { %491 = vmatprep.subr.mxu1 %v1570_v3  ;;  %1372 = vmatpush3.msra.mxu0 %v668_v8 }
  0x2d   :  { %492 = vmatpush2.msra.mxu1 %v439_v40  ;;  %1373 = vmatprep.subr.mxu0 %v1570_v3 }
  0x2e   :  { %1285 = vmatmul.mubr.msk.f32.gmra.mxu0 %vm71_vm0, %v35_v35  ;;  %493 = vmatprep.subr.mxu1 %v1570_v3 }
  0x2f   :  { %271 = vmatprep.mubr.f32.mxu0 %v1570_v3  ;;  %494 = vmatpush2.msra.mxu1 %v438_v42 }
  0x30   :  { %495 = vmatprep.subr.mxu1 %v1570_v3  ;;  %1374 = vmatpush3.msra.mxu0 %v667_v10 }
  0x31   :  { %496 = vmatpush2.msra.mxu1 %v437_v43  ;;  %1375 = vmatprep.subr.mxu0 %v1570_v3 }
  0x32   :  { %1286 = vmatmul.mubr.msk.f32.gmra.mxu0 %vm71_vm0, %v36_v38  ;;  %497 = vmatprep.subr.mxu1 %v1570_v3 }
  0x33   :  { %277 = vmatprep.mubr.f32.mxu0 %v1570_v3  ;;  %498 = vmatpush2.msra.mxu1 %v436_v45 }
  0x34   :  { %499 = vmatprep.subr.mxu1 %v1570_v3 }
  0x35   :  { %500 = vmatpush2.msra.mxu1 %v435_v46 }
  0x36   :  { %1287 = vmatmul.mubr.msk.f32.gmra.mxu0 %vm71_vm0, %v37_v41  ;;  %501 = vmatprep.subr.mxu1 %v1570_v3 }
  0x37   :  { %283 = vmatprep.mubr.f32.mxu0 %v1570_v3  ;;  %502 = vmatpush2.msra.mxu1 %v434_v48 }
  0x38   :  { %503 = vmatprep.subr.mxu1 %v1570_v3 }
  0x39   :  { %504 = vmatpush2.msra.mxu1 %v433_v49 }
  0x3a   :  { %1288 = vmatmul.mubr.msk.f32.gmra.mxu0 %vm71_vm0, %v38_v44  ;;  %505 = vmatprep.subr.mxu1 %v1570_v3 }
  0x3b   :  { %289 = vmatprep.mubr.f32.mxu0 %v1570_v3  ;;  %506 = vmatpush2.msra.mxu1 %v432_v51 }
  0x3c   :  { %507 = vmatprep.subr.mxu1 %v1570_v3 }
  0x3d   :  { %508 = vmatpush2.msra.mxu1 %v431_v54 }
  0x3e   :  { %1289 = vmatmul.mubr.msk.f32.gmra.mxu0 %vm71_vm0, %v39_v47  ;;  %509 = vmatprep.subr.mxu1 %v1570_v3 }
  0x3f   :  { %295 = vmatprep.mubr.f32.mxu0 %v1570_v3  ;;  %510 = vmatpush2.msra.mxu1 %v430_v56 }
  0x40   :  { %511 = vmatprep.subr.mxu1 %v1570_v3 }
  0x41   :  { %512 = vmatpush2.msra.mxu1 %v429_v57 }
  0x42   :  { %1290 = vmatmul.mubr.msk.f32.gmra.mxu0 %vm71_vm0, %v40_v50  ;;  %513 = vmatprep.subr.mxu1 %v1570_v3 }
  0x43   :  { %301 = vmatprep.mubr.f32.mxu0 %v1570_v3  ;;  %514 = vmatpush2.msra.mxu1 %v428_v59 }
  0x44   :  { %1452 = vmatprep.subr.mxu1 %v1570_v3 }
  0x46   :  { %1291 = vmatmul.mubr.msk.f32.gmra.mxu0 %vm71_vm0, %v41_v52 }
  0x47   :  { %307 = vmatprep.mubr.f32.mxu0 %v1570_v3 }
  0x4a   :  { %1292 = vmatmul.mubr.msk.f32.gmra.mxu0 %vm71_vm0, %v42_v53 }
  0x4b   :  { %313 = vmatprep.mubr.f32.mxu0 %v1570_v3 }
  0x4e   :  { %1293 = vmatmul.mubr.msk.f32.gmra.mxu0 %vm71_vm0, %v43_v55 }
  0x4f   :  { %319 = vmatprep.mubr.f32.mxu0 %v1570_v3 }
  0x52   :  { %1294 = vmatmul.mubr.msk.f32.gmra.mxu0 %vm71_vm0, %v44_v58 }
  0x53   :  { %325 = vmatprep.mubr.f32.mxu0 %v1570_v3 }
  0x56   :  { %1295 = vmatmul.mubr.msk.f32.gmra.mxu0 %vm71_vm0, %v45_v60 }
  0x57   :  { %331 = vmatprep.mubr.f32.mxu0 %v1570_v3 }
  0x5a   :  { %1296 = vmatmul.mubr.msk.f32.gmra.mxu0 %vm71_vm0, %v46_v61 }
  0x5b   :  { %337 = vmatprep.mubr.f32.mxu0 %v1570_v3 }
  0x5e   :  { %1297 = vmatmul.mubr.msk.f32.gmra.mxu0 %vm71_vm0, %v47_v62 }
  0x5f   :  { %343 = vmatprep.mubr.f32.mxu0 %v1570_v3 }
  0x62   :  { %1298 = vmatmul.mubr.msk.f32.gmra.mxu0 %vm71_vm0, %v48_v63 }
  0x63   :  { %349 = vmatprep.mubr.f32.mxu0 %v1570_v3 }
  0x66   :  { %1299 = vmatmul.mubr.msk.f32.gmra.mxu0 %vm71_vm0, %v49_v0 }
  0x67   :  { %355 = vmatprep.mubr.f32.mxu0 %v1570_v3 }
  0x6a   :  { %1300 = vmatmul.mubr.msk.f32.gmra.mxu0 %vm71_vm0, %v50_v1 }
  0x6b   :  { %1377 = vmatprep.mubr.msk.f32.mxu0 %vm1571_vm1, %v1570_v3 }
  0xca   :  { %v213_v17 = vpop.f32.mrf.mxu0 }
  0xcb   :  { %v214_v18 = vadd.f32 %v213_v17, %v1922_v15 }
  0xcc   :  { %v215_v19 = vpop.f32.mrf.mxu0 }
  0xcd   :  { %v216_v20 = vadd.f32 %v215_v19, %v1924_v16  ;;  %v362_v23 = vmax.f32 %v214_v18, 0.0 }
  0xce   :  { %v219_v21 = vpop.f32.mrf.mxu0 }
  0xcf   :  { %v363_v22 = vmax.f32 %v216_v20, 0.0  ;;  %v220_v24 = vadd.f32 %v219_v21, %v1922_v15 }
  0xd0   :  { %v221_v25 = vpop.f32.mrf.mxu0 }
  0xd1   :  { %v222_v26 = vadd.f32 %v221_v25, %v1924_v16  ;;  %515 = vmatprep.mubr.f32.mxu1 %v363_v22  ;;  %v364_v29 = vmax.f32 %v220_v24, 0.0 }
  0xd2   :  { %v225_v27 = vpop.f32.mrf.mxu0  ;;  %516 = vmatmul.mubr.f32.vlgmr.msra.gmra.mxu1 %v362_v23 }
  0xd3   :  { %v365_v28 = vmax.f32 %v222_v26, 0.0  ;;  %1460 = vmatpush3.msra.mxu1 %v673_v2  ;;  %v226_v30 = vadd.f32 %v225_v27, %v1922_v15 }
  0xd4   :  { %v227_v31 = vpop.f32.mrf.mxu0  ;;  %1453 = vmatprep.subr.mxu1 %v1570_v3 }
  0xd5   :  { %v228_v32 = vadd.f32 %v227_v31, %v1924_v16  ;;  %520 = vmatprep.mubr.f32.mxu1 %v365_v28  ;;  %1461 = vmatpush3.msra.mxu1 %v672_v4  ;;  %v366_v35 = vmax.f32 %v226_v30, 0.0 }
  0xd6   :  { %v231_v33 = vpop.f32.mrf.mxu0  ;;  %521 = vmatmul.mubr.f32.gmra.mxu1 %v364_v29  ;;  %1454 = vmatprep.subr.mxu1 %v1570_v3 }
  0xd7   :  { %v367_v34 = vmax.f32 %v228_v32, 0.0  ;;  %1462 = vmatpush3.msra.mxu1 %v671_v5  ;;  %v232_v36 = vadd.f32 %v231_v33, %v1922_v15 }
  0xd8   :  { %v233_v37 = vpop.f32.mrf.mxu0  ;;  %1455 = vmatprep.subr.mxu1 %v1570_v3 }
  0xd9   :  { %v234_v38 = vadd.f32 %v233_v37, %v1924_v16  ;;  %525 = vmatprep.mubr.f32.mxu1 %v367_v34  ;;  %1463 = vmatpush3.msra.mxu1 %v670_v6  ;;  %v368_v41 = vmax.f32 %v232_v36, 0.0 }
  0xda   :  { %v237_v39 = vpop.f32.mrf.mxu0  ;;  %526 = vmatmul.mubr.f32.gmra.mxu1 %v366_v35  ;;  %1456 = vmatprep.subr.mxu1 %v1570_v3 }
  0xdb   :  { %v369_v40 = vmax.f32 %v234_v38, 0.0  ;;  %1464 = vmatpush3.msra.mxu1 %v669_v7  ;;  %v238_v42 = vadd.f32 %v237_v39, %v1922_v15 }
  0xdc   :  { %v239_v43 = vpop.f32.mrf.mxu0  ;;  %1457 = vmatprep.subr.mxu1 %v1570_v3 }
  0xdd   :  { %v240_v44 = vadd.f32 %v239_v43, %v1924_v16  ;;  %530 = vmatprep.mubr.f32.mxu1 %v369_v40  ;;  %1465 = vmatpush3.msra.mxu1 %v668_v8  ;;  %v370_v47 = vmax.f32 %v238_v42, 0.0 }
  0xde   :  { %v243_v45 = vpop.f32.mrf.mxu0  ;;  %531 = vmatmul.mubr.f32.gmra.mxu1 %v368_v41  ;;  %1458 = vmatprep.subr.mxu1 %v1570_v3 }
  0xdf   :  { %v371_v46 = vmax.f32 %v240_v44, 0.0  ;;  %1466 = vmatpush3.msra.mxu1 %v667_v10  ;;  %v244_v48 = vadd.f32 %v243_v45, %v1922_v15 }
  0xe0   :  { %v245_v49 = vpop.f32.mrf.mxu0  ;;  %1459 = vmatprep.subr.mxu1 %v1570_v3 }
  0xe1   :  { %v246_v50 = vadd.f32 %v245_v49, %v1924_v16  ;;  %535 = vmatprep.mubr.f32.mxu1 %v371_v46  ;;  %v372_v53 = vmax.f32 %v244_v48, 0.0 }
  0xe2   :  { %v249_v51 = vpop.f32.mrf.mxu0  ;;  %536 = vmatmul.mubr.f32.gmra.mxu1 %v370_v47 }
  0xe3   :  { %v373_v52 = vmax.f32 %v246_v50, 0.0  ;;  %v250_v54 = vadd.f32 %v249_v51, %v1922_v15 }
  0xe4   :  { %v251_v55 = vpop.f32.mrf.mxu0 }
  0xe5   :  { %v252_v56 = vadd.f32 %v251_v55, %v1924_v16  ;;  %540 = vmatprep.mubr.f32.mxu1 %v373_v52  ;;  %v374_v59 = vmax.f32 %v250_v54, 0.0 }
  0xe6   :  { %v255_v57 = vpop.f32.mrf.mxu0  ;;  %541 = vmatmul.mubr.f32.gmra.mxu1 %v372_v53 }
  0xe7   :  { %v375_v58 = vmax.f32 %v252_v56, 0.0  ;;  %v256_v60 = vadd.f32 %v255_v57, %v1922_v15 }
  0xe8   :  { %v257_v61 = vpop.f32.mrf.mxu0 }
  0xe9   :  { %v258_v62 = vadd.f32 %v257_v61, %v1924_v16  ;;  %545 = vmatprep.mubr.f32.mxu1 %v375_v58  ;;  %v376_v1 = vmax.f32 %v256_v60, 0.0 }
  0xea   :  { %v261_v63 = vpop.f32.mrf.mxu0  ;;  %546 = vmatmul.mubr.f32.gmra.mxu1 %v374_v59 }
  0xeb   :  { %v377_v0 = vmax.f32 %v258_v62, 0.0  ;;  %v262_v2 = vadd.f32 %v261_v63, %v1922_v15 }
  0xec   :  { %v263_v4 = vpop.f32.mrf.mxu0 }
  0xed   :  { %v264_v5 = vadd.f32 %v263_v4, %v1924_v16  ;;  %550 = vmatprep.mubr.f32.mxu1 %v377_v0  ;;  %v378_v8 = vmax.f32 %v262_v2, 0.0 }
  0xee   :  { %v267_v6 = vpop.f32.mrf.mxu0  ;;  %551 = vmatmul.mubr.f32.gmra.mxu1 %v376_v1 }
  0xef   :  { %v379_v7 = vmax.f32 %v264_v5, 0.0  ;;  %v268_v9 = vadd.f32 %v267_v6, %v1922_v15  ;;  %v666_v5 = vld [vmem:[%s2399_s5] sm:$0xff] }
  0xf0   :  { %v269_v10 = vpop.f32.mrf.mxu0  ;;  %1376 = vmatpush3.msra.mxu0 %v666_v5  ;;  %1467 = vmatpush3.msra.mxu1 %v666_v5 }
  0xf1   :  { %v270_v11 = vadd.f32 %v269_v10, %v1924_v16  ;;  %555 = vmatprep.mubr.f32.mxu1 %v379_v7  ;;  %v380_v14 = vmax.f32 %v268_v9, 0.0 }
  0xf2   :  { %v273_v12 = vpop.f32.mrf.mxu0  ;;  %556 = vmatmul.mubr.f32.gmra.mxu1 %v378_v8 }
  0xf3   :  { %v381_v13 = vmax.f32 %v270_v11, 0.0  ;;  %v274_v17 = vadd.f32 %v273_v12, %v1922_v15 }
  0xf4   :  { %v275_v18 = vpop.f32.mrf.mxu0 }
  0xf5   :  { %v276_v19 = vadd.f32 %v275_v18, %v1924_v16  ;;  %560 = vmatprep.mubr.f32.mxu1 %v381_v13  ;;  %v382_v22 = vmax.f32 %v274_v17, 0.0 }
  0xf6   :  { %v279_v20 = vpop.f32.mrf.mxu0  ;;  %561 = vmatmul.mubr.f32.gmra.mxu1 %v380_v14 }
  0xf7   :  { %v383_v21 = vmax.f32 %v276_v19, 0.0  ;;  %v280_v23 = vadd.f32 %v279_v20, %v1922_v15 }
  0xf8   :  { %v281_v24 = vpop.f32.mrf.mxu0 }
  0xf9   :  { %v282_v25 = vadd.f32 %v281_v24, %v1924_v16  ;;  %565 = vmatprep.mubr.f32.mxu1 %v383_v21  ;;  %v384_v28 = vmax.f32 %v280_v23, 0.0 }
  0xfa   :  { %v285_v26 = vpop.f32.mrf.mxu0  ;;  %566 = vmatmul.mubr.f32.gmra.mxu1 %v382_v22 }
  0xfb   :  { %v385_v27 = vmax.f32 %v282_v25, 0.0  ;;  %v286_v29 = vadd.f32 %v285_v26, %v1922_v15 }
  0xfc   :  { %v287_v30 = vpop.f32.mrf.mxu0 }
  0xfd   :  { %v288_v31 = vadd.f32 %v287_v30, %v1924_v16  ;;  %570 = vmatprep.mubr.f32.mxu1 %v385_v27  ;;  %v386_v34 = vmax.f32 %v286_v29, 0.0 }
  0xfe   :  { %v291_v32 = vpop.f32.mrf.mxu0  ;;  %571 = vmatmul.mubr.f32.gmra.mxu1 %v384_v28 }
  0xff   :  { %v387_v33 = vmax.f32 %v288_v31, 0.0  ;;  %v292_v35 = vadd.f32 %v291_v32, %v1922_v15 }
 0x100   :  { %v293_v36 = vpop.f32.mrf.mxu0 }
 0x101   :  { %v294_v37 = vadd.f32 %v293_v36, %v1924_v16  ;;  %575 = vmatprep.mubr.f32.mxu1 %v387_v33  ;;  %v388_v40 = vmax.f32 %v292_v35, 0.0 }
 0x102   :  { %v297_v38 = vpop.f32.mrf.mxu0  ;;  %576 = vmatmul.mubr.f32.gmra.mxu1 %v386_v34 }
 0x103   :  { %v389_v39 = vmax.f32 %v294_v37, 0.0  ;;  %v298_v41 = vadd.f32 %v297_v38, %v1922_v15 }
 0x104   :  { %v299_v42 = vpop.f32.mrf.mxu0 }
 0x105   :  { %v300_v43 = vadd.f32 %v299_v42, %v1924_v16  ;;  %580 = vmatprep.mubr.f32.mxu1 %v389_v39  ;;  %v390_v46 = vmax.f32 %v298_v41, 0.0 }
 0x106   :  { %v303_v44 = vpop.f32.mrf.mxu0  ;;  %581 = vmatmul.mubr.f32.gmra.mxu1 %v388_v40 }
 0x107   :  { %v391_v45 = vmax.f32 %v300_v43, 0.0  ;;  %v304_v47 = vadd.f32 %v303_v44, %v1922_v15 }
 0x108   :  { %v305_v48 = vpop.f32.mrf.mxu0 }
 0x109   :  { %v306_v49 = vadd.f32 %v305_v48, %v1924_v16  ;;  %585 = vmatprep.mubr.f32.mxu1 %v391_v45  ;;  %v392_v52 = vmax.f32 %v304_v47, 0.0 }
 0x10a   :  { %v309_v50 = vpop.f32.mrf.mxu0  ;;  %586 = vmatmul.mubr.f32.gmra.mxu1 %v390_v46  ;;  %v1993_v46 = vld [vmem:[%s2401_s4] ss:$0 sm:$0xff] }
 0x10b   :  { %v393_v51 = vmax.f32 %v306_v49, 0.0  ;;  %v310_v53 = vadd.f32 %v309_v50, %v1922_v15 }
 0x10c   :  { %v311_v54 = vpop.f32.mrf.mxu0 }
 0x10d   :  { %v312_v55 = vadd.f32 %v311_v54, %v1924_v16  ;;  %590 = vmatprep.mubr.f32.mxu1 %v393_v51  ;;  %v394_v58 = vmax.f32 %v310_v53, 0.0 }
 0x10e   :  { %v315_v56 = vpop.f32.mrf.mxu0  ;;  %591 = vmatmul.mubr.f32.gmra.mxu1 %v392_v52 }
 0x10f   :  { %v395_v57 = vmax.f32 %v312_v55, 0.0  ;;  %v316_v59 = vadd.f32 %v315_v56, %v1922_v15 }
 0x110   :  { %v317_v60 = vpop.f32.mrf.mxu0 }
 0x111   :  { %v318_v61 = vadd.f32 %v317_v60, %v1924_v16  ;;  %595 = vmatprep.mubr.f32.mxu1 %v395_v57  ;;  %v396_v0 = vmax.f32 %v316_v59, 0.0 }
 0x112   :  { %v321_v62 = vpop.f32.mrf.mxu0  ;;  %596 = vmatmul.mubr.f32.gmra.mxu1 %v394_v58 }
 0x113   :  { %v397_v63 = vmax.f32 %v318_v61, 0.0  ;;  %v322_v1 = vadd.f32 %v321_v62, %v1922_v15 }
 0x114   :  { %v323_v2 = vpop.f32.mrf.mxu0 }
 0x115   :  { %v324_v4 = vadd.f32 %v323_v2, %v1924_v16  ;;  %600 = vmatprep.mubr.f32.mxu1 %v397_v63  ;;  %v398_v8 = vmax.f32 %v322_v1, 0.0 }
 0x116   :  { %v327_v6 = vpop.f32.mrf.mxu0  ;;  %601 = vmatmul.mubr.f32.gmra.mxu1 %v396_v0 }
 0x117   :  { %v399_v7 = vmax.f32 %v324_v4, 0.0  ;;  %v328_v9 = vadd.f32 %v327_v6, %v1922_v15 }
 0x118   :  { %v329_v10 = vpop.f32.mrf.mxu0 }
 0x119   :  { %v330_v11 = vadd.f32 %v329_v10, %v1924_v16  ;;  %605 = vmatprep.mubr.f32.mxu1 %v399_v7  ;;  %v400_v14 = vmax.f32 %v328_v9, 0.0 }
 0x11a   :  { %v333_v12 = vpop.f32.mrf.mxu0  ;;  %606 = vmatmul.mubr.f32.gmra.mxu1 %v398_v8 }
 0x11b   :  { %v401_v13 = vmax.f32 %v330_v11, 0.0  ;;  %v334_v17 = vadd.f32 %v333_v12, %v1922_v15 }
 0x11c   :  { %v335_v18 = vpop.f32.mrf.mxu0 }
 0x11d   :  { %v336_v19 = vadd.f32 %v335_v18, %v1924_v16  ;;  %610 = vmatprep.mubr.f32.mxu1 %v401_v13  ;;  %v402_v22 = vmax.f32 %v334_v17, 0.0 }
 0x11e   :  { %v339_v20 = vpop.f32.mrf.mxu0  ;;  %611 = vmatmul.mubr.f32.gmra.mxu1 %v400_v14 }
 0x11f   :  { %v403_v21 = vmax.f32 %v336_v19, 0.0  ;;  %v340_v23 = vadd.f32 %v339_v20, %v1922_v15 }
 0x120   :  { %v341_v24 = vpop.f32.mrf.mxu0 }
 0x121   :  { %v342_v25 = vadd.f32 %v341_v24, %v1924_v16  ;;  %615 = vmatprep.mubr.f32.mxu1 %v403_v21  ;;  %v404_v28 = vmax.f32 %v340_v23, 0.0 }
 0x122   :  { %v345_v26 = vpop.f32.mrf.mxu0  ;;  %616 = vmatmul.mubr.f32.gmra.mxu1 %v402_v22 }
 0x123   :  { %v405_v27 = vmax.f32 %v342_v25, 0.0  ;;  %v346_v29 = vadd.f32 %v345_v26, %v1922_v15 }
 0x124   :  { %v347_v30 = vpop.f32.mrf.mxu0 }
 0x125   :  { %v348_v31 = vadd.f32 %v347_v30, %v1924_v16  ;;  %620 = vmatprep.mubr.f32.mxu1 %v405_v27  ;;  %v406_v34 = vmax.f32 %v346_v29, 0.0 }
 0x126   :  { %v351_v32 = vpop.f32.mrf.mxu0  ;;  %621 = vmatmul.mubr.f32.gmra.mxu1 %v404_v28 }
 0x127   :  { %v407_v33 = vmax.f32 %v348_v31, 0.0  ;;  %v352_v35 = vadd.f32 %v351_v32, %v1922_v15 }
 0x128   :  { %v353_v36 = vpop.f32.mrf.mxu0 }
 0x129   :  { %v354_v37 = vadd.f32 %v353_v36, %v1924_v16  ;;  %625 = vmatprep.mubr.f32.mxu1 %v407_v33  ;;  %v408_v40 = vmax.f32 %v352_v35, 0.0 }
 0x12a   :  { %v357_v38 = vpop.f32.mrf.mxu0  ;;  %626 = vmatmul.mubr.f32.gmra.mxu1 %v406_v34 }
 0x12b   :  { %v409_v39 = vmax.f32 %v354_v37, 0.0  ;;  %v358_v41 = vadd.f32 %v357_v38, %v1922_v15 }
 0x12c   :  { %v359_v42 = vpop.f32.mrf.mxu0 }
 0x12d   :  { %v360_v43 = vadd.f32 %v359_v42, %v1924_v16  ;;  %630 = vmatprep.mubr.f32.mxu1 %v409_v39  ;;  %v410_v45 = vmax.f32 %v358_v41, 0.0 }
 0x12e   :  { %631 = vmatmul.mubr.f32.gmra.mxu1 %v408_v40 }
 0x12f   :  { %v411_v44 = vmax.f32 %v360_v43, 0.0 }
 0x131   :  { %635 = vmatprep.mubr.f32.mxu1 %v411_v44 }
 0x132   :  { %636 = vmatmul.mubr.f32.gmra.mxu1 %v410_v45 }
 0x133   :  { %1437 = vmatprep.mubr.msk.f32.mxu1 %vm1571_vm1, %v1570_v3 }
 0x192   :  { %v517_v47 = vpop.f32.mrf.mxu1 }
 0x193   :  { %v518_v15 = vadd.f32 %v1993_v46, %v517_v47 }
 0x194   :  { %v519_v48 = vpop.f32.mrf.mxu1 }
 0x195   :  { %v641_v16 = vmax.f32 %v518_v15, 0.0 }
 0x196   :  { %v522_v49 = vpop.f32.mrf.mxu1 }
 0x197   :  { %v523_v50 = vadd.f32 %v1993_v46, %v522_v49  ;;  %1378 = vmatmul.mubr.msk.f32.vlgmr.msra.gmra.mxu0 %vm681_vm2, %v641_v16 }
 0x198   :  { %v524_v51 = vpop.f32.mrf.mxu1  ;;  %1380 = vmatprep.mubr.msk.f32.mxu0 %vm1571_vm1, %v1570_v3 }
 0x199   :  { %v642_v52 = vmax.f32 %v523_v50, 0.0 }
 0x19a   :  { %v527_v53 = vpop.f32.mrf.mxu1 }
 0x19b   :  { %v528_v54 = vadd.f32 %v1993_v46, %v527_v53  ;;  %1381 = vmatmul.mubr.msk.f32.gmra.mxu0 %vm681_vm2, %v642_v52 }
 0x19c   :  { %v529_v55 = vpop.f32.mrf.mxu1  ;;  %1383 = vmatprep.mubr.msk.f32.mxu0 %vm1571_vm1, %v1570_v3 }
 0x19d   :  { %v643_v56 = vmax.f32 %v528_v54, 0.0 }
 0x19e   :  { %v532_v57 = vpop.f32.mrf.mxu1 }
 0x19f   :  { %v533_v58 = vadd.f32 %v1993_v46, %v532_v57  ;;  %1384 = vmatmul.mubr.msk.f32.gmra.mxu0 %vm681_vm2, %v643_v56 }
 0x1a0   :  { %v534_v59 = vpop.f32.mrf.mxu1  ;;  %1386 = vmatprep.mubr.msk.f32.mxu0 %vm1571_vm1, %v1570_v3 }
 0x1a1   :  { %v644_v60 = vmax.f32 %v533_v58, 0.0 }
 0x1a2   :  { %v537_v61 = vpop.f32.mrf.mxu1 }
 0x1a3   :  { %v538_v62 = vadd.f32 %v1993_v46, %v537_v61  ;;  %1387 = vmatmul.mubr.msk.f32.gmra.mxu0 %vm681_vm2, %v644_v60 }
 0x1a4   :  { %v539_v63 = vpop.f32.mrf.mxu1  ;;  %1389 = vmatprep.mubr.msk.f32.mxu0 %vm1571_vm1, %v1570_v3 }
 0x1a5   :  { %v645_v0 = vmax.f32 %v538_v62, 0.0 }
 0x1a6   :  { %v542_v1 = vpop.f32.mrf.mxu1 }
 0x1a7   :  { %v543_v2 = vadd.f32 %v1993_v46, %v542_v1  ;;  %1390 = vmatmul.mubr.msk.f32.gmra.mxu0 %vm681_vm2, %v645_v0 }
 0x1a8   :  { %v544_v4 = vpop.f32.mrf.mxu1  ;;  %1392 = vmatprep.mubr.msk.f32.mxu0 %vm1571_vm1, %v1570_v3 }
 0x1a9   :  { %v646_v5 = vmax.f32 %v543_v2, 0.0 }
 0x1aa   :  { %v547_v6 = vpop.f32.mrf.mxu1 }
 0x1ab   :  { %v548_v7 = vadd.f32 %v1993_v46, %v547_v6  ;;  %1393 = vmatmul.mubr.msk.f32.gmra.mxu0 %vm681_vm2, %v646_v5 }
 0x1ac   :  { %v549_v8 = vpop.f32.mrf.mxu1  ;;  %1395 = vmatprep.mubr.msk.f32.mxu0 %vm1571_vm1, %v1570_v3 }
 0x1ad   :  { %v647_v9 = vmax.f32 %v548_v7, 0.0 }
 0x1ae   :  { %v552_v10 = vpop.f32.mrf.mxu1 }
 0x1af   :  { %v553_v11 = vadd.f32 %v1993_v46, %v552_v10  ;;  %1396 = vmatmul.mubr.msk.f32.gmra.mxu0 %vm681_vm2, %v647_v9 }
 0x1b0   :  { %v554_v12 = vpop.f32.mrf.mxu1  ;;  %1398 = vmatprep.mubr.msk.f32.mxu0 %vm1571_vm1, %v1570_v3 }
 0x1b1   :  { %v648_v13 = vmax.f32 %v553_v11, 0.0 }
 0x1b2   :  { %v557_v14 = vpop.f32.mrf.mxu1 }
 0x1b3   :  { %v558_v17 = vadd.f32 %v1993_v46, %v557_v14  ;;  %1399 = vmatmul.mubr.msk.f32.gmra.mxu0 %vm681_vm2, %v648_v13 }
 0x1b4   :  { %v559_v18 = vpop.f32.mrf.mxu1  ;;  %1401 = vmatprep.mubr.msk.f32.mxu0 %vm1571_vm1, %v1570_v3 }
 0x1b5   :  { %v649_v19 = vmax.f32 %v558_v17, 0.0 }
 0x1b6   :  { %v562_v20 = vpop.f32.mrf.mxu1 }
 0x1b7   :  { %v563_v21 = vadd.f32 %v1993_v46, %v562_v20  ;;  %1402 = vmatmul.mubr.msk.f32.gmra.mxu0 %vm681_vm2, %v649_v19 }
 0x1b8   :  { %v564_v22 = vpop.f32.mrf.mxu1  ;;  %1404 = vmatprep.mubr.msk.f32.mxu0 %vm1571_vm1, %v1570_v3 }
 0x1b9   :  { %v650_v23 = vmax.f32 %v563_v21, 0.0  ;;  %v2094_v22 = vld [vmem:[%s2402_s6] ss:$0 sm:$0xff] }
 0x1ba   :  { %v567_v24 = vpop.f32.mrf.mxu1 }
 0x1bb   :  { %v568_v25 = vadd.f32 %v1993_v46, %v567_v24  ;;  %1405 = vmatmul.mubr.msk.f32.gmra.mxu0 %vm681_vm2, %v650_v23 }
 0x1bc   :  { %v569_v26 = vpop.f32.mrf.mxu1  ;;  %1407 = vmatprep.mubr.msk.f32.mxu0 %vm1571_vm1, %v1570_v3 }
 0x1bd   :  { %v651_v27 = vmax.f32 %v568_v25, 0.0 }
 0x1be   :  { %v572_v28 = vpop.f32.mrf.mxu1 }
 0x1bf   :  { %v573_v29 = vadd.f32 %v1993_v46, %v572_v28  ;;  %1408 = vmatmul.mubr.msk.f32.gmra.mxu0 %vm681_vm2, %v651_v27 }
 0x1c0   :  { %v574_v30 = vpop.f32.mrf.mxu1  ;;  %1410 = vmatprep.mubr.msk.f32.mxu0 %vm1571_vm1, %v1570_v3 }
 0x1c1   :  { %v652_v31 = vmax.f32 %v573_v29, 0.0 }
 0x1c2   :  { %v577_v32 = vpop.f32.mrf.mxu1 }
 0x1c3   :  { %v578_v33 = vadd.f32 %v1993_v46, %v577_v32  ;;  %1411 = vmatmul.mubr.msk.f32.gmra.mxu0 %vm681_vm2, %v652_v31 }
 0x1c4   :  { %v579_v34 = vpop.f32.mrf.mxu1  ;;  %1413 = vmatprep.mubr.msk.f32.mxu0 %vm1571_vm1, %v1570_v3 }
 0x1c5   :  { %v653_v35 = vmax.f32 %v578_v33, 0.0 }
 0x1c6   :  { %v582_v36 = vpop.f32.mrf.mxu1 }
 0x1c7   :  { %v583_v37 = vadd.f32 %v1993_v46, %v582_v36  ;;  %1414 = vmatmul.mubr.msk.f32.gmra.mxu0 %vm681_vm2, %v653_v35 }
 0x1c8   :  { %v584_v38 = vpop.f32.mrf.mxu1  ;;  %1416 = vmatprep.mubr.msk.f32.mxu0 %vm1571_vm1, %v1570_v3 }
 0x1c9   :  { %v654_v39 = vmax.f32 %v583_v37, 0.0 }
 0x1ca   :  { %v587_v40 = vpop.f32.mrf.mxu1 }
 0x1cb   :  { %v588_v41 = vadd.f32 %v1993_v46, %v587_v40  ;;  %1417 = vmatmul.mubr.msk.f32.gmra.mxu0 %vm681_vm2, %v654_v39 }
 0x1cc   :  { %v589_v42 = vpop.f32.mrf.mxu1  ;;  %1419 = vmatprep.mubr.msk.f32.mxu0 %vm1571_vm1, %v1570_v3 }
 0x1cd   :  { %v655_v43 = vmax.f32 %v588_v41, 0.0 }
 0x1ce   :  { %v592_v44 = vpop.f32.mrf.mxu1 }
 0x1cf   :  { %v593_v45 = vadd.f32 %v1993_v46, %v592_v44  ;;  %1420 = vmatmul.mubr.msk.f32.gmra.mxu0 %vm681_vm2, %v655_v43 }
 0x1d0   :  { %v594_v47 = vpop.f32.mrf.mxu1  ;;  %1422 = vmatprep.mubr.msk.f32.mxu0 %vm1571_vm1, %v1570_v3 }
 0x1d1   :  { %v656_v15 = vmax.f32 %v593_v45, 0.0 }
 0x1d2   :  { %v597_v48 = vpop.f32.mrf.mxu1 }
 0x1d3   :  { %v598_v16 = vadd.f32 %v1993_v46, %v597_v48  ;;  %1423 = vmatmul.mubr.msk.f32.gmra.mxu0 %vm681_vm2, %v656_v15 }
 0x1d4   :  { %v599_v49 = vpop.f32.mrf.mxu1  ;;  %1425 = vmatprep.mubr.msk.f32.mxu0 %vm1571_vm1, %v1570_v3 }
 0x1d5   :  { %v657_v50 = vmax.f32 %v598_v16, 0.0 }
 0x1d6   :  { %v602_v51 = vpop.f32.mrf.mxu1 }
 0x1d7   :  { %v603_v52 = vadd.f32 %v1993_v46, %v602_v51  ;;  %1426 = vmatmul.mubr.msk.f32.gmra.mxu0 %vm681_vm2, %v657_v50 }
 0x1d8   :  { %v604_v53 = vpop.f32.mrf.mxu1  ;;  %1428 = vmatprep.mubr.msk.f32.mxu0 %vm1571_vm1, %v1570_v3 }
 0x1d9   :  { %v658_v54 = vmax.f32 %v603_v52, 0.0 }
 0x1da   :  { %v607_v55 = vpop.f32.mrf.mxu1 }
 0x1db   :  { %v608_v56 = vadd.f32 %v1993_v46, %v607_v55  ;;  %1429 = vmatmul.mubr.msk.f32.gmra.mxu0 %vm681_vm2, %v658_v54 }
 0x1dc   :  { %v609_v57 = vpop.f32.mrf.mxu1  ;;  %1431 = vmatprep.mubr.msk.f32.mxu0 %vm1571_vm1, %v1570_v3 }
 0x1dd   :  { %v659_v58 = vmax.f32 %v608_v56, 0.0 }
 0x1de   :  { %v612_v59 = vpop.f32.mrf.mxu1 }
 0x1df   :  { %v613_v60 = vadd.f32 %v1993_v46, %v612_v59  ;;  %1432 = vmatmul.mubr.msk.f32.gmra.mxu0 %vm681_vm2, %v659_v58 }
 0x1e0   :  { %v614_v61 = vpop.f32.mrf.mxu1  ;;  %1434 = vmatprep.mubr.msk.f32.mxu0 %vm1571_vm1, %v1570_v3 }
 0x1e1   :  { %v660_v62 = vmax.f32 %v613_v60, 0.0 }
 0x1e2   :  { %v617_v63 = vpop.f32.mrf.mxu1 }
 0x1e3   :  { %v618_v0 = vadd.f32 %v1993_v46, %v617_v63  ;;  %1435 = vmatmul.mubr.msk.f32.gmra.mxu0 %vm681_vm2, %v660_v62 }
 0x1e4   :  { %v619_v1 = vpop.f32.mrf.mxu1 }
 0x1e5   :  { %v661_v2 = vmax.f32 %v618_v0, 0.0 }
 0x1e6   :  { %v622_v4 = vpop.f32.mrf.mxu1 }
 0x1e7   :  { %v623_v5 = vadd.f32 %v1993_v46, %v622_v4  ;;  %1438 = vmatmul.mubr.msk.f32.vlgmr.msra.gmra.mxu1 %vm681_vm2, %v661_v2 }
 0x1e8   :  { %v624_v6 = vpop.f32.mrf.mxu1  ;;  %1440 = vmatprep.mubr.msk.f32.mxu1 %vm1571_vm1, %v1570_v3 }
 0x1e9   :  { %v662_v7 = vmax.f32 %v623_v5, 0.0 }
 0x1ea   :  { %v627_v8 = vpop.f32.mrf.mxu1 }
 0x1eb   :  { %v628_v9 = vadd.f32 %v1993_v46, %v627_v8  ;;  %1441 = vmatmul.mubr.msk.f32.gmra.mxu1 %vm681_vm2, %v662_v7 }
 0x1ec   :  { %v629_v10 = vpop.f32.mrf.mxu1  ;;  %1443 = vmatprep.mubr.msk.f32.mxu1 %vm1571_vm1, %v1570_v3 }
 0x1ed   :  { %v663_v11 = vmax.f32 %v628_v9, 0.0 }
 0x1ee   :  { %v632_v12 = vpop.f32.mrf.mxu1 }
 0x1ef   :  { %v633_v13 = vadd.f32 %v1993_v46, %v632_v12  ;;  %1444 = vmatmul.mubr.msk.f32.gmra.mxu1 %vm681_vm2, %v663_v11 }
 0x1f0   :  { %v634_v14 = vpop.f32.mrf.mxu1  ;;  %1446 = vmatprep.mubr.msk.f32.mxu1 %vm1571_vm1, %v1570_v3 }
 0x1f1   :  { %v664_v17 = vmax.f32 %v633_v13, 0.0 }
 0x1f2   :  { %v637_v18 = vpop.f32.mrf.mxu1 }
 0x1f3   :  { %v638_v19 = vadd.f32 %v1993_v46, %v637_v18  ;;  %1447 = vmatmul.mubr.msk.f32.gmra.mxu1 %vm681_vm2, %v664_v17 }
 0x1f4   :  { %v639_v20 = vpop.f32.mrf.mxu1  ;;  %1449 = vmatprep.mubr.msk.f32.mxu1 %vm1571_vm1, %v1570_v3 }
 0x1f5   :  { %v665_v21 = vmax.f32 %v638_v19, 0.0 }
 0x1f7   :  { %1450 = vmatmul.mubr.msk.f32.gmra.mxu1 %vm681_vm2, %v665_v21 }
 0x257   :  { %v823_v23 = vpop.f32.mrf.mxu0 }
 0x258   :  { %v2097_v24 = vadd.f32 %v2094_v22, %v823_v23 }
 0x259   :  { %v1379_v25 = vpop.f32.mrf.mxu0 }
 0x25a   :  { %947 = vmax.xlane.f32.xlu0 %v2097_v24 }
 0x25b   :  { %v828_v46 = vpop.f32.mrf.mxu0 }
 0x25c   :  { %v2101_v26 = vadd.f32 %v2094_v22, %v828_v46 }
 0x25d   :  { %v1382_v3 = vpop.f32.mrf.mxu0 }
 0x25e   :  { %949 = vmax.xlane.f32.xlu0 %v2101_v26 }
 0x25f   :  { %v833_v27 = vpop.f32.mrf.mxu0 }
 0x260   :  { %v2105_v28 = vadd.f32 %v2094_v22, %v833_v27 }
 0x261   :  { %v1385_v29 = vpop.f32.mrf.mxu0 }
 0x262   :  { %951 = vmax.xlane.f32.xlu1 %v2105_v28 }
 0x263   :  { %v838_v30 = vpop.f32.mrf.mxu0 }
 0x264   :  { %v2109_v31 = vadd.f32 %v2094_v22, %v838_v30 }
 0x265   :  { %v1388_v32 = vpop.f32.mrf.mxu0 }
 0x266   :  { %953 = vmax.xlane.f32.xlu1 %v2109_v31 }
 0x267   :  { %v843_v33 = vpop.f32.mrf.mxu0 }
 0x268   :  { %v2113_v34 = vadd.f32 %v2094_v22, %v843_v33 }
 0x269   :  { %v1391_v35 = vpop.f32.mrf.mxu0 }
 0x26a   :  { %955 = vmax.xlane.f32.xlu0 %v2113_v34 }
 0x26b   :  { %v848_v36 = vpop.f32.mrf.mxu0 }
 0x26c   :  { %v2117_v37 = vadd.f32 %v2094_v22, %v848_v36 }
 0x26d   :  { %v1394_v38 = vpop.f32.mrf.mxu0 }
 0x26e   :  { %957 = vmax.xlane.f32.xlu1 %v2117_v37 }
 0x26f   :  { %v853_v39 = vpop.f32.mrf.mxu0 }
 0x270   :  { %v2121_v40 = vadd.f32 %v2094_v22, %v853_v39 }
 0x271   :  { %v1397_v41 = vpop.f32.mrf.mxu0 }
 0x272   :  { %959 = vmax.xlane.f32.xlu0 %v2121_v40 }
 0x273   :  { %v858_v42 = vpop.f32.mrf.mxu0 }
 0x274   :  { %v2125_v43 = vadd.f32 %v2094_v22, %v858_v42 }
 0x275   :  { %v1400_v44 = vpop.f32.mrf.mxu0 }
 0x276   :  { %961 = vmax.xlane.f32.xlu1 %v2125_v43 }
 0x277   :  { %v863_v45 = vpop.f32.mrf.mxu0 }
 0x278   :  { %v2129_v47 = vadd.f32 %v2094_v22, %v863_v45 }
 0x279   :  { %v1403_v15 = vpop.f32.mrf.mxu0 }
 0x27a   :  { %963 = vmax.xlane.f32.xlu0 %v2129_v47 }
 0x27b   :  { %v868_v48 = vpop.f32.mrf.mxu0 }
 0x27c   :  { %v2133_v16 = vadd.f32 %v2094_v22, %v868_v48 }
 0x27d   :  { %v1406_v49 = vpop.f32.mrf.mxu0 }
 0x27e   :  { %965 = vmax.xlane.f32.xlu1 %v2133_v16 }
 0x27f   :  { %v873_v50 = vpop.f32.mrf.mxu0 }
 0x280   :  { %v2137_v51 = vadd.f32 %v2094_v22, %v873_v50 }
 0x281   :  { %v1409_v52 = vpop.f32.mrf.mxu0 }
 0x282   :  { %967 = vmax.xlane.f32.xlu0 %v2137_v51 }
 0x283   :  { %v878_v53 = vpop.f32.mrf.mxu0 }
 0x284   :  { %v2141_v54 = vadd.f32 %v2094_v22, %v878_v53 }
 0x285   :  { %v1412_v55 = vpop.f32.mrf.mxu0 }
 0x286   :  { %969 = vmax.xlane.f32.xlu1 %v2141_v54 }
 0x287   :  { %v883_v56 = vpop.f32.mrf.mxu0 }
 0x288   :  { %v2145_v57 = vadd.f32 %v2094_v22, %v883_v56 }
 0x289   :  { %v1415_v58 = vpop.f32.mrf.mxu0 }
 0x28a   :  { %971 = vmax.xlane.f32.xlu0 %v2145_v57 }
 0x28b   :  { %v888_v59 = vpop.f32.mrf.mxu0 }
 0x28c   :  { %v2149_v60 = vadd.f32 %v2094_v22, %v888_v59 }
 0x28d   :  { %v1418_v61 = vpop.f32.mrf.mxu0 }
 0x28e   :  { %973 = vmax.xlane.f32.xlu1 %v2149_v60 }
 0x28f   :  { %v893_v62 = vpop.f32.mrf.mxu0 }
 0x290   :  { %v2153_v63 = vadd.f32 %v2094_v22, %v893_v62 }
 0x291   :  { %v1421_v0 = vpop.f32.mrf.mxu0 }
 0x292   :  { %975 = vmax.xlane.f32.xlu0 %v2153_v63 }
 0x293   :  { %v898_v1 = vpop.f32.mrf.mxu0 }
 0x294   :  { %v2157_v2 = vadd.f32 %v2094_v22, %v898_v1 }
 0x295   :  { %v1424_v4 = vpop.f32.mrf.mxu0 }
 0x296   :  { %977 = vmax.xlane.f32.xlu1 %v2157_v2 }
 0x297   :  { %v903_v5 = vpop.f32.mrf.mxu0 }
 0x298   :  { %v2161_v6 = vadd.f32 %v2094_v22, %v903_v5 }
 0x299   :  { %v1427_v7 = vpop.f32.mrf.mxu0 }
 0x29a   :  { %979 = vmax.xlane.f32.xlu0 %v2161_v6 }
 0x29b   :  { %v908_v8 = vpop.f32.mrf.mxu0 }
 0x29c   :  { %v2165_v9 = vadd.f32 %v2094_v22, %v908_v8 }
 0x29d   :  { %v1430_v10 = vpop.f32.mrf.mxu0 }
 0x29e   :  { %981 = vmax.xlane.f32.xlu1 %v2165_v9 }
 0x29f   :  { %v913_v11 = vpop.f32.mrf.mxu0 }
 0x2a0   :  { %v2169_v12 = vadd.f32 %v2094_v22, %v913_v11 }
 0x2a1   :  { %v1433_v13 = vpop.f32.mrf.mxu0 }
 0x2a2   :  { %983 = vmax.xlane.f32.xlu0 %v2169_v12 }
 0x2a3   :  { %v918_v14 = vpop.f32.mrf.mxu0 }
 0x2a4   :  { %v2173_v17 = vadd.f32 %v2094_v22, %v918_v14 }
 0x2a5   :  { %v1436_v18 = vpop.f32.mrf.mxu0 }
 0x2a6   :  { %985 = vmax.xlane.f32.xlu1 %v2173_v17 }
 0x2a7   :  { %v923_v19 = vpop.f32.mrf.mxu1 }
 0x2a8   :  { %v2177_v20 = vadd.f32 %v2094_v22, %v923_v19 }
 0x2a9   :  { %v1439_v21 = vpop.f32.mrf.mxu1 }
 0x2aa   :  { %987 = vmax.xlane.f32.xlu0 %v2177_v20 }
 0x2ab   :  { %v928_v23 = vpop.f32.mrf.mxu1 }
 0x2ac   :  { %v2181_v25 = vadd.f32 %v2094_v22, %v928_v23 }
 0x2ad   :  { %v1442_v46 = vpop.f32.mrf.mxu1 }
 0x2ae   :  { %989 = vmax.xlane.f32.xlu1 %v2181_v25 }
 0x2af   :  { %v933_v3 = vpop.f32.mrf.mxu1 }
 0x2b0   :  { %v2185_v27 = vadd.f32 %v2094_v22, %v933_v3 }
 0x2b1   :  { %v1445_v29 = vpop.f32.mrf.mxu1 }
 0x2b2   :  { %991 = vmax.xlane.f32.xlu0 %v2185_v27 }
 0x2b3   :  { %v938_v30 = vpop.f32.mrf.mxu1 }
 0x2b4   :  { %v2189_v32 = vadd.f32 %v2094_v22, %v938_v30 }
 0x2b5   :  { %v1448_v33 = vpop.f32.mrf.mxu1 }
 0x2b6   :  { %993 = vmax.xlane.f32.xlu1 %v2189_v32 }
 0x2b7   :  { %v943_v35 = vpop.f32.mrf.mxu1 }
 0x2b8   :  { %v2193_v36 = vadd.f32 %v2094_v22, %v943_v35 }
 0x2b9   :  { %v1451_v38 = vpop.f32.mrf.mxu1 }
 0x2ba   :  { %995 = vmax.xlane.f32.xlu0 %v2193_v36 }
 0x2e3   :  { %v948_v39 = vpop.xlane.xlu0 %947 }
 0x2e4   :  { %v997_v41 = vsub.f32 %v2097_v24, %v948_v39 }
 0x2e6   :  { %v1022_v42 = vmul.f32 1.442695, %v997_v41 }
 0x2e7   :  { %v950_v44 = vpop.xlane.xlu0 %949 }
 0x2e8   :  { %1470 = vpow2.f32 %v1022_v42  ;;  %v998_v45 = vsub.f32 %v2101_v26, %v950_v44 }
 0x2ea   :  { %v1024_v15 = vmul.f32 1.442695, %v998_v45 }
 0x2eb   :  { %v952_v48 = vpop.xlane.xlu1 %951 }
 0x2ec   :  { %1472 = vpow2.f32 %v1024_v15  ;;  %v999_v49 = vsub.f32 %v2105_v28, %v952_v48 }
 0x2ee   :  { %v1026_v50 = vmul.f32 1.442695, %v999_v49 }
 0x2ef   :  { %v954_v52 = vpop.xlane.xlu1 %953 }
 0x2f0   :  { %1474 = vpow2.f32 %v1026_v50  ;;  %v1000_v22 = vsub.f32 %v2109_v31, %v954_v52 }
 0x2f2   :  { %v1028_v53 = vmul.f32 1.442695, %v1000_v22 }
 0x2f3   :  { %v956_v55 = vpop.xlane.xlu0 %955 }
 0x2f4   :  { %1476 = vpow2.f32 %v1028_v53  ;;  %v1001_v24 = vsub.f32 %v2113_v34, %v956_v55 }
 0x2f5   :  { %v2201_v56 = vpop.eup %1470 }
 0x2f6   :  { %v1030_v58 = vmul.f32 1.442695, %v1001_v24  ;;  %1072 = vadd.xlane.f32.xlu1 %v2201_v56 }
 0x2f7   :  { %v958_v26 = vpop.xlane.xlu1 %957 }
 0x2f8   :  { %1478 = vpow2.f32 %v1030_v58  ;;  %v1002_v59 = vsub.f32 %v2117_v37, %v958_v26 }
 0x2f9   :  { %v2205_v28 = vpop.eup %1472 }
 0x2fa   :  { %v1032_v61 = vmul.f32 1.442695, %v1002_v59  ;;  %1074 = vadd.xlane.f32.xlu0 %v2205_v28 }
 0x2fb   :  { %v960_v31 = vpop.xlane.xlu0 %959 }
 0x2fc   :  { %1480 = vpow2.f32 %v1032_v61  ;;  %v1003_v62 = vsub.f32 %v2121_v40, %v960_v31 }
 0x2fd   :  { %v2209_v0 = vpop.eup %1474 }
 0x2fe   :  { %v1034_v34 = vmul.f32 1.442695, %v1003_v62  ;;  %1076 = vadd.xlane.f32.xlu1 %v2209_v0 }
 0x2ff   :  { %v962_v1 = vpop.xlane.xlu1 %961 }
 0x300   :  { %1482 = vpow2.f32 %v1034_v34  ;;  %v1004_v4 = vsub.f32 %v2125_v43, %v962_v1 }
 0x301   :  { %v2213_v5 = vpop.eup %1476 }
 0x302   :  { %v1036_v37 = vmul.f32 1.442695, %v1004_v4  ;;  %1078 = vadd.xlane.f32.xlu0 %v2213_v5 }
 0x303   :  { %v964_v7 = vpop.xlane.xlu0 %963 }
 0x304   :  { %1484 = vpow2.f32 %v1036_v37  ;;  %v1005_v8 = vsub.f32 %v2129_v47, %v964_v7 }
 0x305   :  { %v2217_v10 = vpop.eup %1478 }
 0x306   :  { %v1038_v40 = vmul.f32 1.442695, %v1005_v8  ;;  %1080 = vadd.xlane.f32.xlu1 %v2217_v10 }
 0x307   :  { %v966_v11 = vpop.xlane.xlu1 %965 }
 0x308   :  { %1486 = vpow2.f32 %v1038_v40  ;;  %v1006_v13 = vsub.f32 %v2133_v16, %v966_v11 }
 0x309   :  { %v2221_v14 = vpop.eup %1480 }
 0x30a   :  { %v1040_v43 = vmul.f32 1.442695, %v1006_v13  ;;  %1082 = vadd.xlane.f32.xlu0 %v2221_v14 }
 0x30b   :  { %v968_v18 = vpop.xlane.xlu0 %967 }
 0x30c   :  { %1488 = vpow2.f32 %v1040_v43  ;;  %v1007_v19 = vsub.f32 %v2137_v51, %v968_v18 }
 0x30d   :  { %v2225_v21 = vpop.eup %1482 }
 0x30e   :  { %v1042_v47 = vmul.f32 1.442695, %v1007_v19  ;;  %1084 = vadd.xlane.f32.xlu1 %v2225_v21 }
 0x30f   :  { %v970_v23 = vpop.xlane.xlu1 %969 }
 0x310   :  { %1490 = vpow2.f32 %v1042_v47  ;;  %v1008_v46 = vsub.f32 %v2141_v54, %v970_v23 }
 0x311   :  { %v2229_v3 = vpop.eup %1484 }
 0x312   :  { %v1044_v16 = vmul.f32 1.442695, %v1008_v46  ;;  %1086 = vadd.xlane.f32.xlu0 %v2229_v3 }
 0x313   :  { %v972_v29 = vpop.xlane.xlu0 %971 }
 0x314   :  { %1492 = vpow2.f32 %v1044_v16  ;;  %v1009_v30 = vsub.f32 %v2145_v57, %v972_v29 }
 0x315   :  { %v2233_v33 = vpop.eup %1486 }
 0x316   :  { %v1046_v51 = vmul.f32 1.442695, %v1009_v30  ;;  %1088 = vadd.xlane.f32.xlu1 %v2233_v33 }
 0x317   :  { %v974_v35 = vpop.xlane.xlu1 %973 }
 0x318   :  { %1494 = vpow2.f32 %v1046_v51  ;;  %v1010_v38 = vsub.f32 %v2149_v60, %v974_v35 }
 0x319   :  { %v2237_v39 = vpop.eup %1488 }
 0x31a   :  { %v1048_v54 = vmul.f32 1.442695, %v1010_v38  ;;  %1090 = vadd.xlane.f32.xlu0 %v2237_v39 }
 0x31b   :  { %v976_v41 = vpop.xlane.xlu0 %975 }
 0x31c   :  { %1496 = vpow2.f32 %v1048_v54  ;;  %v1011_v42 = vsub.f32 %v2153_v63, %v976_v41 }
 0x31d   :  { %v2241_v44 = vpop.eup %1490 }
 0x31e   :  { %v1050_v57 = vmul.f32 1.442695, %v1011_v42  ;;  %1092 = vadd.xlane.f32.xlu1 %v2241_v44 }
 0x31f   :  { %v978_v45 = vpop.xlane.xlu1 %977 }
 0x320   :  { %1498 = vpow2.f32 %v1050_v57  ;;  %v1012_v15 = vsub.f32 %v2157_v2, %v978_v45 }
 0x321   :  { %v2245_v48 = vpop.eup %1492 }
 0x322   :  { %v1052_v60 = vmul.f32 1.442695, %v1012_v15  ;;  %1094 = vadd.xlane.f32.xlu0 %v2245_v48 }
 0x323   :  { %v980_v49 = vpop.xlane.xlu0 %979 }
 0x324   :  { %1500 = vpow2.f32 %v1052_v60  ;;  %v1013_v50 = vsub.f32 %v2161_v6, %v980_v49 }
 0x325   :  { %v2249_v52 = vpop.eup %1494 }
 0x326   :  { %v1054_v63 = vmul.f32 1.442695, %v1013_v50  ;;  %1096 = vadd.xlane.f32.xlu1 %v2249_v52 }
 0x327   :  { %v982_v22 = vpop.xlane.xlu1 %981 }
 0x328   :  { %1502 = vpow2.f32 %v1054_v63  ;;  %v1014_v53 = vsub.f32 %v2165_v9, %v982_v22 }
 0x329   :  { %v2253_v55 = vpop.eup %1496 }
 0x32a   :  { %v1056_v2 = vmul.f32 1.442695, %v1014_v53  ;;  %1098 = vadd.xlane.f32.xlu0 %v2253_v55 }
 0x32b   :  { %v984_v24 = vpop.xlane.xlu0 %983 }
 0x32c   :  { %1504 = vpow2.f32 %v1056_v2  ;;  %v1015_v58 = vsub.f32 %v2169_v12, %v984_v24 }
 0x32d   :  { %v2257_v26 = vpop.eup %1498 }
 0x32e   :  { %v1058_v6 = vmul.f32 1.442695, %v1015_v58  ;;  %1100 = vadd.xlane.f32.xlu1 %v2257_v26 }
 0x32f   :  { %v986_v59 = vpop.xlane.xlu1 %985 }
 0x330   :  { %1506 = vpow2.f32 %v1058_v6  ;;  %v1016_v61 = vsub.f32 %v2173_v17, %v986_v59 }
 0x331   :  { %v2261_v31 = vpop.eup %1500 }
 0x332   :  { %v1060_v9 = vmul.f32 1.442695, %v1016_v61  ;;  %1102 = vadd.xlane.f32.xlu0 %v2261_v31 }
 0x333   :  { %v988_v62 = vpop.xlane.xlu0 %987 }
 0x334   :  { %1508 = vpow2.f32 %v1060_v9  ;;  %v1017_v34 = vsub.f32 %v2177_v20, %v988_v62 }
 0x335   :  { %v2265_v1 = vpop.eup %1502 }
 0x336   :  { %v1062_v12 = vmul.f32 1.442695, %v1017_v34  ;;  %1104 = vadd.xlane.f32.xlu1 %v2265_v1 }
 0x337   :  { %v990_v4 = vpop.xlane.xlu1 %989 }
 0x338   :  { %1510 = vpow2.f32 %v1062_v12  ;;  %v1018_v37 = vsub.f32 %v2181_v25, %v990_v4 }
 0x339   :  { %v2269_v7 = vpop.eup %1504 }
 0x33a   :  { %v1064_v17 = vmul.f32 1.442695, %v1018_v37  ;;  %1106 = vadd.xlane.f32.xlu0 %v2269_v7 }
 0x33b   :  { %v992_v8 = vpop.xlane.xlu0 %991 }
 0x33c   :  { %1512 = vpow2.f32 %v1064_v17  ;;  %v1019_v40 = vsub.f32 %v2185_v27, %v992_v8 }
 0x33d   :  { %v2273_v11 = vpop.eup %1506 }
 0x33e   :  { %v1066_v20 = vmul.f32 1.442695, %v1019_v40  ;;  %1108 = vadd.xlane.f32.xlu1 %v2273_v11 }
 0x33f   :  { %v994_v13 = vpop.xlane.xlu1 %993 }
 0x340   :  { %1514 = vpow2.f32 %v1066_v20  ;;  %v1020_v43 = vsub.f32 %v2189_v32, %v994_v13 }
 0x341   :  { %v2277_v18 = vpop.eup %1508 }
 0x342   :  { %v1068_v25 = vmul.f32 1.442695, %v1020_v43  ;;  %1110 = vadd.xlane.f32.xlu0 %v2277_v18 }
 0x343   :  { %v996_v19 = vpop.xlane.xlu0 %995 }
 0x344   :  { %1516 = vpow2.f32 %v1068_v25  ;;  %v1021_v47 = vsub.f32 %v2193_v36, %v996_v19 }
 0x345   :  { %v2281_v23 = vpop.eup %1510 }
 0x346   :  { %v1070_v27 = vmul.f32 1.442695, %v1021_v47  ;;  %1112 = vadd.xlane.f32.xlu1 %v2281_v23 }
 0x348   :  { %1518 = vpow2.f32 %v1070_v27 }
 0x349   :  { %v2284_v46 = vpop.eup %1512 }
 0x34a   :  { %1114 = vadd.xlane.f32.xlu0 %v2284_v46 }
 0x34d   :  { %v2287_v32 = vpop.eup %1514 }
 0x34e   :  { %1116 = vadd.xlane.f32.xlu1 %v2287_v32 }
 0x351   :  { %v2290_v16 = vpop.eup %1516 }
 0x352   :  { %1118 = vadd.xlane.f32.xlu0 %v2290_v16 }
 0x355   :  { %v2293_v29 = vpop.eup %1518 }
 0x356   :  { %1120 = vadd.xlane.f32.xlu1 %v2293_v29 }
 0x37f   :  { %v1073_v36 = vpop.xlane.xlu1 %1072 }
 0x380   :  { %1520 = vrcp.f32 %v1073_v36 }
 0x383   :  { %v1075_v30 = vpop.xlane.xlu0 %1074 }
 0x384   :  { %1522 = vrcp.f32 %v1075_v30 }
 0x387   :  { %v1077_v51 = vpop.xlane.xlu1 %1076 }
 0x388   :  { %1524 = vrcp.f32 %v1077_v51 }
 0x38b   :  { %v1079_v35 = vpop.xlane.xlu0 %1078 }
 0x38c   :  { %1526 = vrcp.f32 %v1079_v35 }
 0x38d   :  { %v1521_v38 = vpop.eup %1520 }
 0x38e   :  { %v1147_v54 = vmul.f32 %v1521_v38, %v1073_v36 }
 0x38f   :  { %v1081_v41 = vpop.xlane.xlu1 %1080 }
 0x390   :  { %v1172_v42 = vsub.f32 2.0, %v1147_v54  ;;  %1528 = vrcp.f32 %v1081_v41 }
 0x391   :  { %v1523_v57 = vpop.eup %1522 }
 0x392   :  { %v1197_v45 = vmul.f32 %v1521_v38, %v1172_v42  ;;  %v1148_v15 = vmul.f32 %v1523_v57, %v1075_v30 }
 0x393   :  { %v1083_v60 = vpop.xlane.xlu0 %1082 }
 0x394   :  { %v1222_v49 = vmul.f32 %v2201_v56, %v1197_v45  ;;  %v1173_v50 = vsub.f32 2.0, %v1148_v15  ;;  %1530 = vrcp.f32 %v1083_v60 }
 0x395   :  { %v1525_v63 = vpop.eup %1524 }
 0x396   :  { %1247 = vst [vmem:[%s2403_s7] sm:$0xff] %v1222_v49  ;;  %v1198_v22 = vmul.f32 %v1523_v57, %v1173_v50  ;;  %v1149_v53 = vmul.f32 %v1525_v63, %v1077_v51 }
 0x397   :  { %v1085_v2 = vpop.xlane.xlu1 %1084 }
 0x398   :  { %v1223_v24 = vmul.f32 %v2205_v28, %v1198_v22  ;;  %v1174_v58 = vsub.f32 2.0, %v1149_v53  ;;  %1532 = vrcp.f32 %v1085_v2 }
 0x399   :  { %v1527_v6 = vpop.eup %1526 }
 0x39a   :  { %1248 = vst [vmem:[%s2403_s7 + $0x8] sm:$0xff] %v1223_v24  ;;  %v1199_v56 = vmul.f32 %v1525_v63, %v1174_v58  ;;  %v1150_v59 = vmul.f32 %v1527_v6, %v1079_v35 }
 0x39b   :  { %v1087_v61 = vpop.xlane.xlu0 %1086 }
 0x39c   :  { %v1224_v9 = vmul.f32 %v2209_v0, %v1199_v56  ;;  %v1175_v62 = vsub.f32 2.0, %v1150_v59  ;;  %1534 = vrcp.f32 %v1087_v61 }
 0x39d   :  { %v1529_v34 = vpop.eup %1528 }
 0x39e   :  { %1249 = vst [vmem:[%s2403_s7 + $0x10] sm:$0xff] %v1224_v9  ;;  %v1200_v28 = vmul.f32 %v1527_v6, %v1175_v62  ;;  %v1151_v12 = vmul.f32 %v1529_v34, %v1081_v41 }
 0x39f   :  { %v1089_v4 = vpop.xlane.xlu1 %1088 }
 0x3a0   :  { %v1225_v37 = vmul.f32 %v2213_v5, %v1200_v28  ;;  %v1176_v17 = vsub.f32 2.0, %v1151_v12  ;;  %1536 = vrcp.f32 %v1089_v4 }
 0x3a1   :  { %v1531_v8 = vpop.eup %1530 }
 0x3a2   :  { %1250 = vst [vmem:[%s2403_s7 + $0x18] sm:$0xff] %v1225_v37  ;;  %v1201_v0 = vmul.f32 %v1529_v34, %v1176_v17  ;;  %v1152_v40 = vmul.f32 %v1531_v8, %v1083_v60 }
 0x3a3   :  { %v1091_v20 = vpop.xlane.xlu0 %1090 }
 0x3a4   :  { %v1226_v13 = vmul.f32 %v2217_v10, %v1201_v0  ;;  %v1177_v43 = vsub.f32 2.0, %v1152_v40  ;;  %1538 = vrcp.f32 %v1091_v20 }
 0x3a5   :  { %v1533_v25 = vpop.eup %1532 }
 0x3a6   :  { %1251 = vst [vmem:[%s2403_s7 + $0x20] sm:$0xff] %v1226_v13  ;;  %v1202_v5 = vmul.f32 %v1531_v8, %v1177_v43  ;;  %v1153_v19 = vmul.f32 %v1533_v25, %v1085_v2 }
 0x3a7   :  { %v1093_v47 = vpop.xlane.xlu1 %1092 }
 0x3a8   :  { %v1227_v27 = vmul.f32 %v2221_v14, %v1202_v5  ;;  %v1178_v36 = vsub.f32 2.0, %v1153_v19  ;;  %1540 = vrcp.f32 %v1093_v47 }
 0x3a9   :  { %v1535_v30 = vpop.eup %1534 }
 0x3aa   :  { %1252 = vst [vmem:[%s2403_s7 + $0x28] sm:$0xff] %v1227_v27  ;;  %v1203_v10 = vmul.f32 %v1533_v25, %v1178_v36  ;;  %v1154_v51 = vmul.f32 %v1535_v30, %v1087_v61 }
 0x3ab   :  { %v1095_v35 = vpop.xlane.xlu0 %1094 }
 0x3ac   :  { %v1228_v38 = vmul.f32 %v2225_v21, %v1203_v10  ;;  %v1179_v54 = vsub.f32 2.0, %v1154_v51  ;;  %1542 = vrcp.f32 %v1095_v35 }
 0x3ad   :  { %v1537_v41 = vpop.eup %1536 }
 0x3ae   :  { %1253 = vst [vmem:[%s2403_s7 + $0x30] sm:$0xff] %v1228_v38  ;;  %v1204_v14 = vmul.f32 %v1535_v30, %v1179_v54  ;;  %v1155_v42 = vmul.f32 %v1537_v41, %v1089_v4 }
 0x3af   :  { %v1097_v57 = vpop.xlane.xlu1 %1096 }
 0x3b0   :  { %v1229_v45 = vmul.f32 %v2229_v3, %v1204_v14  ;;  %v1180_v15 = vsub.f32 2.0, %v1155_v42  ;;  %1544 = vrcp.f32 %v1097_v57 }
 0x3b1   :  { %v1539_v60 = vpop.eup %1538 }
 0x3b2   :  { %1254 = vst [vmem:[%s2403_s7 + $0x38] sm:$0xff] %v1229_v45  ;;  %v1205_v21 = vmul.f32 %v1537_v41, %v1180_v15  ;;  %v1156_v49 = vmul.f32 %v1539_v60, %v1091_v20 }
 0x3b3   :  { %v1099_v50 = vpop.xlane.xlu0 %1098 }
 0x3b4   :  { %v1230_v63 = vmul.f32 %v2233_v33, %v1205_v21  ;;  %v1181_v22 = vsub.f32 2.0, %v1156_v49  ;;  %1546 = vrcp.f32 %v1099_v50 }
 0x3b5   :  { %v1541_v53 = vpop.eup %1540 }
 0x3b6   :  { %1255 = vst [vmem:[%s2403_s7 + $0x40] sm:$0xff] %v1230_v63  ;;  %v1206_v3 = vmul.f32 %v1539_v60, %v1181_v22  ;;  %v1157_v2 = vmul.f32 %v1541_v53, %v1093_v47 }
 0x3b7   :  { %v1101_v24 = vpop.xlane.xlu1 %1100 }
 0x3b8   :  { %v1231_v58 = vmul.f32 %v2237_v39, %v1206_v3  ;;  %v1182_v6 = vsub.f32 2.0, %v1157_v2  ;;  %1548 = vrcp.f32 %v1101_v24 }
 0x3b9   :  { %v1543_v56 = vpop.eup %1542 }
 0x3ba   :  { %1256 = vst [vmem:[%s2403_s7 + $0x48] sm:$0xff] %v1231_v58  ;;  %v1207_v33 = vmul.f32 %v1541_v53, %v1182_v6  ;;  %v1158_v59 = vmul.f32 %v1543_v56, %v1095_v35 }
 0x3bb   :  { %v1103_v61 = vpop.xlane.xlu0 %1102 }
 0x3bc   :  { %v1232_v9 = vmul.f32 %v2241_v44, %v1207_v33  ;;  %v1183_v62 = vsub.f32 2.0, %v1158_v59  ;;  %1550 = vrcp.f32 %v1103_v61 }
 0x3bd   :  { %v1545_v34 = vpop.eup %1544 }
 0x3be   :  { %1257 = vst [vmem:[%s2403_s7 + $0x50] sm:$0xff] %v1232_v9  ;;  %v1208_v39 = vmul.f32 %v1543_v56, %v1183_v62  ;;  %v1159_v28 = vmul.f32 %v1545_v34, %v1097_v57 }
 0x3bf   :  { %v1105_v12 = vpop.xlane.xlu1 %1104 }
 0x3c0   :  { %v1233_v4 = vmul.f32 %v2245_v48, %v1208_v39  ;;  %v1184_v37 = vsub.f32 2.0, %v1159_v28  ;;  %1552 = vrcp.f32 %v1105_v12 }
 0x3c1   :  { %v1547_v17 = vpop.eup %1546 }
 0x3c2   :  { %1258 = vst [vmem:[%s2403_s7 + $0x58] sm:$0xff] %v1233_v4  ;;  %v1209_v44 = vmul.f32 %v1545_v34, %v1184_v37  ;;  %v1160_v8 = vmul.f32 %v1547_v17, %v1099_v50 }
 0x3c3   :  { %v1107_v0 = vpop.xlane.xlu0 %1106 }
 0x3c4   :  { %v1234_v40 = vmul.f32 %v2249_v52, %v1209_v44  ;;  %v1185_v20 = vsub.f32 2.0, %v1160_v8  ;;  %1554 = vrcp.f32 %v1107_v0 }
 0x3c5   :  { %v1549_v13 = vpop.eup %1548 }
 0x3c6   :  { %1259 = vst [vmem:[%s2403_s7 + $0x60] sm:$0xff] %v1234_v40  ;;  %v1210_v48 = vmul.f32 %v1547_v17, %v1185_v20  ;;  %v1161_v43 = vmul.f32 %v1549_v13, %v1101_v24 }
 0x3c7   :  { %v1109_v25 = vpop.xlane.xlu1 %1108 }
 0x3c8   :  { %v1235_v5 = vmul.f32 %v2253_v55, %v1210_v48  ;;  %v1186_v19 = vsub.f32 2.0, %v1161_v43  ;;  %1556 = vrcp.f32 %v1109_v25 }
 0x3c9   :  { %v1551_v47 = vpop.eup %1550 }
 0x3ca   :  { %1260 = vst [vmem:[%s2403_s7 + $0x68] sm:$0xff] %v1235_v5  ;;  %v1211_v52 = vmul.f32 %v1549_v13, %v1186_v19  ;;  %v1162_v27 = vmul.f32 %v1551_v47, %v1103_v61 }
 0x3cb   :  { %v1111_v36 = vpop.xlane.xlu0 %1110 }
 0x3cc   :  { %v1236_v30 = vmul.f32 %v2257_v26, %v1211_v52  ;;  %v1187_v10 = vsub.f32 2.0, %v1162_v27  ;;  %1558 = vrcp.f32 %v1111_v36 }
 0x3cd   :  { %v1553_v51 = vpop.eup %1552 }
 0x3ce   :  { %1261 = vst [vmem:[%s2403_s7 + $0x70] sm:$0xff] %v1236_v30  ;;  %v1212_v55 = vmul.f32 %v1551_v47, %v1187_v10  ;;  %v1163_v35 = vmul.f32 %v1553_v51, %v1105_v12 }
 0x3cf   :  { %v1113_v38 = vpop.xlane.xlu1 %1112 }
 0x3d0   :  { %v1237_v54 = vmul.f32 %v2261_v31, %v1212_v55  ;;  %v1188_v41 = vsub.f32 2.0, %v1163_v35  ;;  %1560 = vrcp.f32 %v1113_v38 }
 0x3d1   :  { %v1555_v14 = vpop.eup %1554 }
 0x3d2   :  { %1262 = vst [vmem:[%s2403_s7 + $0x78] sm:$0xff] %v1237_v54  ;;  %v1213_v26 = vmul.f32 %v1553_v51, %v1188_v41  ;;  %v1164_v42 = vmul.f32 %v1555_v14, %v1107_v0 }
 0x3d3   :  { %v1115_v57 = vpop.xlane.xlu0 %1114 }
 0x3d4   :  { %v1238_v45 = vmul.f32 %v2265_v1, %v1213_v26  ;;  %v1189_v15 = vsub.f32 2.0, %v1164_v42  ;;  %1562 = vrcp.f32 %v1115_v57 }
 0x3d5   :  { %v1557_v60 = vpop.eup %1556 }
 0x3d6   :  { %1263 = vst [vmem:[%s2403_s7 + $0x80] sm:$0xff] %v1238_v45  ;;  %v1214_v31 = vmul.f32 %v1555_v14, %v1189_v15  ;;  %v1165_v21 = vmul.f32 %v1557_v60, %v1109_v25 }
 0x3d7   :  { %v1117_v49 = vpop.xlane.xlu1 %1116 }
 0x3d8   :  { %v1239_v50 = vmul.f32 %v2269_v7, %v1214_v31  ;;  %v1190_v63 = vsub.f32 2.0, %v1165_v21  ;;  %1564 = vrcp.f32 %v1117_v49 }
 0x3d9   :  { %v1559_v22 = vpop.eup %1558 }
 0x3da   :  { %1264 = vst [vmem:[%s2403_s7 + $0x88] sm:$0xff] %v1239_v50  ;;  %v1215_v1 = vmul.f32 %v1557_v60, %v1190_v63  ;;  %v1166_v53 = vmul.f32 %v1559_v22, %v1111_v36 }
 0x3db   :  { %v1119_v3 = vpop.xlane.xlu0 %1118 }
 0x3dc   :  { %v1240_v2 = vmul.f32 %v2273_v11, %v1215_v1  ;;  %v1191_v24 = vsub.f32 2.0, %v1166_v53  ;;  %1566 = vrcp.f32 %v1119_v3 }
 0x3dd   :  { %v1561_v58 = vpop.eup %1560 }
 0x3de   :  { %1265 = vst [vmem:[%s2403_s7 + $0x90] sm:$0xff] %v1240_v2  ;;  %v1216_v7 = vmul.f32 %v1559_v22, %v1191_v24  ;;  %v1167_v6 = vmul.f32 %v1561_v58, %v1113_v38 }
 0x3df   :  { %v1121_v56 = vpop.xlane.xlu1 %1120 }
 0x3e0   :  { %v1241_v33 = vmul.f32 %v2277_v18, %v1216_v7  ;;  %v1192_v59 = vsub.f32 2.0, %v1167_v6  ;;  %1568 = vrcp.f32 %v1121_v56 }
 0x3e1   :  { %v1563_v61 = vpop.eup %1562 }
 0x3e2   :  { %1266 = vst [vmem:[%s2403_s7 + $0x98] sm:$0xff] %v1241_v33  ;;  %v1217_v11 = vmul.f32 %v1561_v58, %v1192_v59  ;;  %v1168_v9 = vmul.f32 %v1563_v61, %v1115_v57 }
 0x3e4   :  { %v1242_v62 = vmul.f32 %v2281_v23, %v1217_v11  ;;  %v1193_v34 = vsub.f32 2.0, %v1168_v9 }
 0x3e5   :  { %v1565_v39 = vpop.eup %1564 }
 0x3e6   :  { %1267 = vst [vmem:[%s2403_s7 + $0xa0] sm:$0xff] %v1242_v62  ;;  %v1218_v28 = vmul.f32 %v1563_v61, %v1193_v34  ;;  %v1169_v12 = vmul.f32 %v1565_v39, %v1117_v49 }
 0x3e8   :  { %v1243_v18 = vmul.f32 %v2284_v46, %v1218_v28  ;;  %v1194_v4 = vsub.f32 2.0, %v1169_v12 }
 0x3e9   :  { %v1567_v37 = vpop.eup %1566 }
 0x3ea   :  { %1268 = vst [vmem:[%s2403_s7 + $0xa8] sm:$0xff] %v1243_v18  ;;  %v1219_v17 = vmul.f32 %v1565_v39, %v1194_v4  ;;  %v1170_v44 = vmul.f32 %v1567_v37, %v1119_v3 }
 0x3ec   :  { %v1244_v23 = vmul.f32 %v2287_v32, %v1219_v17  ;;  %v1195_v8 = vsub.f32 2.0, %v1170_v44 }
 0x3ed   :  { %v1569_v0 = vpop.eup %1568 }
 0x3ee   :  { %1269 = vst [vmem:[%s2403_s7 + $0xb0] sm:$0xff] %v1244_v23  ;;  %v1220_v40 = vmul.f32 %v1567_v37, %v1195_v8  ;;  %v1171_v20 = vmul.f32 %v1569_v0, %v1121_v56 }
 0x3f0   :  { %v1245_v46 = vmul.f32 %v2290_v16, %v1220_v40  ;;  %v1196_v13 = vsub.f32 2.0, %v1171_v20 }
 0x3f2   :  { %1270 = vst [vmem:[%s2403_s7 + $0xb8] sm:$0xff] %v1245_v46  ;;  %v1221_v48 = vmul.f32 %v1569_v0, %v1196_v13 }
 0x3f4   :  { %v1246_v43 = vmul.f32 %v2293_v29, %v1221_v48 }
 0x3f6   :  { %1271 = vst [vmem:[%s2403_s7 + $0xc0] sm:$0xff] %v1246_v43 }

</bundles_post_ra>
